<compile_context>
chip_gen: v7x
topology: tpu7x:2x2x1
jax: 0.10.0
libtpu: 0.0.40
codegen_flags: <defaults>
</compile_context>

<pallas_src>
import functools

import jax
import jax.numpy as jnp
from jax.experimental import pallas as pl
from jax.experimental.pallas import tpu as pltpu


def _gelu_tanh(x):
    c = 0.7978845608028654  # sqrt(2/pi)
    return 0.5 * x * (1.0 + jnp.tanh(c * (x + 0.044715 * x * x * x)))


def _choose_seq_tiling(S):
    """Pick a sequence tile and a padded length that it divides.

    Real SigLIP sequence lengths (196, 577, 729, ...) are not cleanly tileable,
    so we pad up to a multiple of the tile and mask padded keys in-kernel."""
    if S >= 128:
        tile = 128
    else:
        tile = ((S + 7) // 8) * 8           # single sublane-aligned tile
    padded = ((S + tile - 1) // tile) * tile
    return tile, padded


def encoder_layer_kernel(x_ref,
                         ln1_g_ref, ln1_b_ref,
                         wqkv_ref, bqkv_ref, wo_ref, bo_ref,
                         ln2_g_ref, ln2_b_ref,
                         w1_ref, b1_ref, w2_ref, b2_ref,
                         o_ref,
                         qkv_scr,
                         *, num_heads, head_dim, tile_s, num_tiles,
                         seq_pad, valid_len, eps):
    D = num_heads * head_dim
    s_idx = pl.program_id(1)

    def layer_norm(z, g_ref, b_ref):
        mu = jnp.mean(z, axis=-1, keepdims=True)
        var = jnp.mean((z - mu) ** 2, axis=-1, keepdims=True)
        return (z - mu) * jax.lax.rsqrt(var + eps) * g_ref[...] + b_ref[...]

    # ---- once per batch element: chunked LN1 + fused QKV projection ----
    # Output lands lane-dense in a single (seq_pad, 3D) bf16 scratch; one wide
    # (tile_s, D) @ (D, 3D) bf16 matmul and one contiguous store per chunk.
    # The 1/sqrt(head_dim) scale is already folded into the Q columns of wqkv.
    @pl.when(s_idx == 0)
    def _project_qkv():
        def chunk(c, carry):
            row0 = pl.multiple_of(c * tile_s, tile_s)
            xf = x_ref[pl.ds(row0, tile_s), :].astype(jnp.float32)
            h = layer_norm(xf, ln1_g_ref, ln1_b_ref)
            qkv = jnp.dot(h.astype(jnp.bfloat16), wqkv_ref[...],
                          preferred_element_type=jnp.float32)
            qkv_scr[pl.ds(row0, tile_s), :] = (qkv + bqkv_ref[...]).astype(jnp.bfloat16)
            return carry
        jax.lax.fori_loop(0, num_tiles, chunk, 0)

    # ---- per sequence tile ----
    start = pl.multiple_of(s_idx * tile_s, tile_s)
    x = x_ref[pl.ds(start, tile_s), :].astype(jnp.float32)      # (tS, D) residual

    if seq_pad > valid_len:   # static: mask padded key positions before softmax
        key_keep = jax.lax.broadcasted_iota(jnp.int32, (1, seq_pad), 1) < valid_len
    else:
        key_keep = None

    # Per-head attention from the lane-dense scratch; the out-projection is
    # accumulated per head (o_h @ wo[h*hd:(h+1)*hd, :]) instead of a cross-lane
    # head concat followed by a full-D matmul.
    attn = jnp.zeros((tile_s, D), jnp.float32)
    for hh in range(num_heads):
        lo = hh * head_dim
        q_h = qkv_scr[pl.ds(start, tile_s), lo:lo + head_dim]           # (tS, hd)
        k_h = qkv_scr[:, D + lo:D + lo + head_dim]                      # (Sp, hd)
        v_h = qkv_scr[:, 2 * D + lo:2 * D + lo + head_dim]              # (Sp, hd)

        s_h = jax.lax.dot_general(q_h, k_h, (((1,), (1,)), ((), ())),
                                  preferred_element_type=jnp.float32)   # (tS, Sp)
        if key_keep is not None:
            s_h = jnp.where(key_keep, s_h, jnp.float32(-1e30))
        m = jnp.max(s_h, axis=-1, keepdims=True)
        e = jnp.exp(s_h - m)
        p = e * pl.reciprocal(jnp.sum(e, axis=-1, keepdims=True), approx=True)
        o_h = jnp.dot(p.astype(jnp.bfloat16), v_h,
                      preferred_element_type=jnp.float32)                # (tS, hd)
        attn = attn + jnp.dot(o_h.astype(jnp.bfloat16),
                              wo_ref[lo:lo + head_dim, :],
                              preferred_element_type=jnp.float32)

    x1 = x + attn + bo_ref[...]                                          # residual 1

    # ---- LayerNorm 2 + MLP (gelu tanh) ----
    h2 = layer_norm(x1, ln2_g_ref, ln2_b_ref)
    g = jnp.dot(h2.astype(jnp.bfloat16), w1_ref[...],
                preferred_element_type=jnp.float32) + b1_ref[...]
    g = _gelu_tanh(g)
    mlp = jnp.dot(g.astype(jnp.bfloat16), w2_ref[...],
                  preferred_element_type=jnp.float32) + b2_ref[...]

    o_ref[...] = (x1 + mlp).astype(o_ref.dtype)                          # residual 2


# kernel-ready parameter order (after prepare_layer_params)
PARAM_ORDER = ("ln1_g", "ln1_b",
               "wqkv", "bqkv", "wo", "bo",
               "ln2_g", "ln2_b",
               "w1", "b1", "w2", "b2")


def prepare_layer_params(p, *, num_heads):
    """Fuse q/k/v weights + biases (scale folded into the Q columns) and cast
    matmul weights to bf16 (halves weight DMA traffic, feeds the MXU at peak)."""
    D = p["wq"].shape[0]
    scale = (D // num_heads) ** -0.5
    wqkv = jnp.concatenate([p["wq"] * scale, p["wk"], p["wv"]], axis=1)
    bqkv = jnp.concatenate([p["bq"] * scale, p["bk"], p["bv"]], axis=1)
    return dict(
        ln1_g=p["ln1_g"], ln1_b=p["ln1_b"],
        wqkv=wqkv.astype(jnp.bfloat16), bqkv=bqkv,
        wo=p["wo"].astype(jnp.bfloat16), bo=p["bo"],
        ln2_g=p["ln2_g"], ln2_b=p["ln2_b"],
        w1=p["w1"].astype(jnp.bfloat16), b1=p["b1"],
        w2=p["w2"].astype(jnp.bfloat16), b2=p["b2"],
    )


def siglip_encoder_layer(x, params, *, num_heads, eps, tile_s, valid_len):
    B, Sp, D = x.shape            # Sp is the (possibly padded) sequence length
    head_dim = D // num_heads
    num_tiles = Sp // tile_s
    I = params["w1"].shape[1]

    kernel = functools.partial(
        encoder_layer_kernel,
        num_heads=num_heads, head_dim=head_dim, tile_s=tile_s,
        num_tiles=num_tiles, seq_pad=Sp, valid_len=valid_len, eps=eps)

    args = [params[name] for name in PARAM_ORDER]

    in_specs = [
        # full-sequence residual-stream block; revisited across the s axis
        pl.BlockSpec((None, Sp, D), lambda b, s: (b, 0, 0)),
    ]
    for a in args:
        nd = a.ndim
        # constant index_map -> single-buffer; double-buffering weights only
        # doubles their VMEM footprint for zero benefit.
        in_specs.append(pl.BlockSpec(a.shape,
                                     lambda b, s, _nd=nd: (0,) * _nd,
                                     pipeline_mode=pl.Buffered(1)))

    # ---- explicit VMEM budget (bytes): x + out (double-buffered), weights
    # (single-buffered), qkv scratch, plus transient headroom. ----
    weight_bytes = sum(int(a.size) * jnp.dtype(a.dtype).itemsize for a in args)
    footprint = (2 * Sp * D * 4                      # x block (double-buffered)
                 + 2 * tile_s * D * 4                # out block (double-buffered)
                 + weight_bytes                      # single-buffered weights
                 + Sp * 3 * D * 2                    # qkv bf16 scratch
                 + 2 * tile_s * (3 * D + I + Sp) * 4)  # per-tile f32 transients
    vmem_limit = max(32 << 20, min(int(footprint * 1.3), 100 << 20))

    flops = int(2 * B * Sp * D * 3 * D               # fused qkv projection
                + 4 * B * Sp * Sp * D                # q@k^T and p@v
                + 2 * B * Sp * D * D                 # out projection
                + 4 * B * Sp * D * I)                # MLP (fc1 + fc2)
    transcendentals = int(B * num_heads * Sp * Sp + B * Sp * I)
    bytes_accessed = int(2 * x.size * jnp.dtype(x.dtype).itemsize + weight_bytes)

    return pl.pallas_call(
        kernel,
        out_shape=jax.ShapeDtypeStruct((B, Sp, D), x.dtype),
        grid=(B, num_tiles),
        in_specs=in_specs,
        out_specs=pl.BlockSpec((None, tile_s, D), lambda b, s: (b, s, 0)),
        scratch_shapes=[pltpu.VMEM((Sp, 3 * D), jnp.bfloat16)],
        # Residual stream is read (once per batch element) before any of that
        # element's output tiles are written back -> safe to alias in place.
        input_output_aliases={0: 0},
        compiler_params=pltpu.CompilerParams(
            dimension_semantics=("parallel", "arbitrary"),
            vmem_limit_bytes=vmem_limit),
        cost_estimate=pl.CostEstimate(flops=flops,
                                      transcendentals=transcendentals,
                                      bytes_accessed=bytes_accessed),
    )(x, *args)


def siglip_encoder(x, layer_params, *, num_heads, eps):
    B, S, D = x.shape
    tile_s, Sp = _choose_seq_tiling(S)
    prepared = [prepare_layer_params(p, num_heads=num_heads) for p in layer_params]
    h = jnp.pad(x, ((0, 0), (0, Sp - S), (0, 0))) if Sp != S else x
    for p in prepared:
        h = siglip_encoder_layer(h, p, num_heads=num_heads, eps=eps,
                                 tile_s=tile_s, valid_len=S)
    return h[:, :S, :] if Sp != S else h


# -------------------- pure-JAX f32 reference (for verification) --------------------
def _ref_layer(x, p, num_heads, eps):
    def ln(z, g, b):
        mu = z.mean(-1, keepdims=True)
        var = ((z - mu) ** 2).mean(-1, keepdims=True)
        return (z - mu) / jnp.sqrt(var + eps) * g[0] + b[0]

    B, S, D = x.shape
    hd = D // num_heads
    h = ln(x, p["ln1_g"], p["ln1_b"])
    q = h @ p["wq"] + p["bq"][0]
    k = h @ p["wk"] + p["bk"][0]
    v = h @ p["wv"] + p["bv"][0]
    q = q.reshape(B, S, num_heads, hd).transpose(0, 2, 1, 3)
    k = k.reshape(B, S, num_heads, hd).transpose(0, 2, 1, 3)
    v = v.reshape(B, S, num_heads, hd).transpose(0, 2, 1, 3)
    s = jnp.einsum("bhqd,bhkd->bhqk", q, k) * hd ** -0.5
    pw = jax.nn.softmax(s, axis=-1)
    o = jnp.einsum("bhqk,bhkd->bhqd", pw, v).transpose(0, 2, 1, 3)
    o = o.reshape(B, S, D) @ p["wo"] + p["bo"][0]
    x1 = x + o
    h2 = ln(x1, p["ln2_g"], p["ln2_b"])
    g = _gelu_tanh(h2 @ p["w1"] + p["b1"][0])
    return x1 + (g @ p["w2"] + p["b2"][0])


def _ref_encoder(x, layer_params, num_heads, eps):
    h = x
    for p in layer_params:
        h = _ref_layer(h, p, num_heads, eps)
    return h


# -------------------- deterministic parameter init --------------------
def init_layer_params(key, D, I):
    key, *ks = jax.random.split(key, 13)

    def w(k, shape):
        return jax.random.normal(k, shape, jnp.float32) * 0.02

    p = dict(
        ln1_g=jnp.ones((1, D), jnp.float32),
        ln1_b=jnp.zeros((1, D), jnp.float32),
        wq=w(ks[0], (D, D)), bq=w(ks[1], (1, D)),
        wk=w(ks[2], (D, D)), bk=w(ks[3], (1, D)),
        wv=w(ks[4], (D, D)), bv=w(ks[5], (1, D)),
        wo=w(ks[6], (D, D)), bo=w(ks[7], (1, D)),
        ln2_g=jnp.ones((1, D), jnp.float32),
        ln2_b=jnp.zeros((1, D), jnp.float32),
        w1=w(ks[8], (D, I)), b1=w(ks[9], (1, I)),
        w2=w(ks[10], (I, D)), b2=w(ks[11], (1, D)),
    )
    return key, p


if __name__ == "__main__":
    # config: hidden_size=32, num_attention_heads=4, intermediate_size=64,
    # num_hidden_layers=2, layer_norm_eps=1e-6, attention_dropout=0.0
    B, S, D, H, I, L = 2, 8, 32, 4, 64, 2
    EPS = 1e-6

    key = jax.random.PRNGKey(0)
    key, xkey = jax.random.split(key)
    inputs_embeds = jax.random.normal(xkey, (B, S, D), jnp.float32)

    layer_params = []
    for _ in range(L):
        key, p = init_layer_params(key, D, I)
        layer_params.append(p)

    run = jax.jit(functools.partial(siglip_encoder, num_heads=H, eps=EPS))
    out = run(inputs_embeds, layer_params)
    out = jax.block_until_ready(out)

    ref = _ref_encoder(inputs_embeds, layer_params, H, EPS)
    assert out.shape == (B, S, D)
    # bf16 matmul operands (f32 accumulation) + approx softmax reciprocal
    # -> loosened tolerance vs the f32 reference
    assert jnp.allclose(out, ref, atol=2e-2, rtol=2e-2), \
        f"max abs err {jnp.max(jnp.abs(out - ref))}"

    print("KERNEL_OK")
</pallas_src>

<mosaic_0001>
module attributes {stable_mosaic.version = 11 : i64} {
  func.func @encoder_layer_kernel(%arg0: i32, %arg1: i32, %arg2: memref<1x8x32xf32, #tpu.memory_space<vmem>>, %arg3: memref<1x32xf32, #tpu.memory_space<vmem>>, %arg4: memref<1x32xf32, #tpu.memory_space<vmem>>, %arg5: memref<32x96xbf16, #tpu.memory_space<vmem>>, %arg6: memref<1x96xf32, #tpu.memory_space<vmem>>, %arg7: memref<32x32xbf16, #tpu.memory_space<vmem>>, %arg8: memref<1x32xf32, #tpu.memory_space<vmem>>, %arg9: memref<1x32xf32, #tpu.memory_space<vmem>>, %arg10: memref<1x32xf32, #tpu.memory_space<vmem>>, %arg11: memref<32x64xbf16, #tpu.memory_space<vmem>>, %arg12: memref<1x64xf32, #tpu.memory_space<vmem>>, %arg13: memref<64x32xbf16, #tpu.memory_space<vmem>>, %arg14: memref<1x32xf32, #tpu.memory_space<vmem>>, %arg15: memref<1x8x32xf32, #tpu.memory_space<vmem>>, %arg16: memref<8x96xbf16, #tpu.memory_space<vmem>>) attributes {dimension_semantics = [#tpu.dimension_semantics<parallel>, #tpu.dimension_semantics<arbitrary>], iteration_bounds = array<i64: 2, 1>, scalar_prefetch = 0 : i64, scratch_operands = 1 : i64, tpu.core_type = #tpu.core_type<tc>, window_params = [{transform_indices = @transform_0, window_bounds = array<i64: 1, 8, 32>}, {pipeline_mode = #tpu.pipeline_mode<synchronous>, transform_indices = @transform_1, window_bounds = array<i64: 1, 32>}, {pipeline_mode = #tpu.pipeline_mode<synchronous>, transform_indices = @transform_2, window_bounds = array<i64: 1, 32>}, {pipeline_mode = #tpu.pipeline_mode<synchronous>, transform_indices = @transform_3, window_bounds = array<i64: 32, 96>}, {pipeline_mode = #tpu.pipeline_mode<synchronous>, transform_indices = @transform_4, window_bounds = array<i64: 1, 96>}, {pipeline_mode = #tpu.pipeline_mode<synchronous>, transform_indices = @transform_5, window_bounds = array<i64: 32, 32>}, {pipeline_mode = #tpu.pipeline_mode<synchronous>, transform_indices = @transform_6, window_bounds = array<i64: 1, 32>}, {pipeline_mode = #tpu.pipeline_mode<synchronous>, transform_indices = @transform_7, window_bounds = array<i64: 1, 32>}, {pipeline_mode = #tpu.pipeline_mode<synchronous>, transform_indices = @transform_8, window_bounds = array<i64: 1, 32>}, {pipeline_mode = #tpu.pipeline_mode<synchronous>, transform_indices = @transform_9, window_bounds = array<i64: 32, 64>}, {pipeline_mode = #tpu.pipeline_mode<synchronous>, transform_indices = @transform_10, window_bounds = array<i64: 1, 64>}, {pipeline_mode = #tpu.pipeline_mode<synchronous>, transform_indices = @transform_11, window_bounds = array<i64: 64, 32>}, {pipeline_mode = #tpu.pipeline_mode<synchronous>, transform_indices = @transform_12, window_bounds = array<i64: 1, 32>}, {transform_indices = @transform_13, window_bounds = array<i64: 1, 8, 32>}]} {
    %c0_i32 = arith.constant 0 : i32
    %0 = arith.cmpi eq, %arg1, %c0_i32 : i32
    %1 = arith.extui %0 : i1 to i32
    %c0_i32_0 = arith.constant 0 : i32
    %2 = arith.cmpi ne, %1, %c0_i32_0 : i32
    scf.if %2 {
      %c0_i32_67 = arith.constant 0 : i32
      %c8_i32_68 = arith.constant 8 : i32
      %150 = arith.muli %c0_i32_67, %c8_i32_68 : i32
      %151 = tpu.assume_multiple %150, 8 : i32
      %c0_69 = arith.constant 0 : index
      %152 = arith.index_cast %151 : i32 to index
      %c0_70 = arith.constant 0 : index
      %153 = vector.load %arg2[%c0_69, %152, %c0_70] : memref<1x8x32xf32, #tpu.memory_space<vmem>>, vector<1x8x32xf32>
      %154 = vector.shape_cast %153 : vector<1x8x32xf32> to vector<8x32xf32>
      %cst_71 = arith.constant dense<0.000000e+00> : vector<8xf32>
      %155 = vector.multi_reduction <add>, %154, %cst_71 [1] : vector<8x32xf32> to vector<8xf32>
      %156 = vector.shape_cast %155 : vector<8xf32> to vector<8x1xf32>
      %cst_72 = arith.constant 3.200000e+01 : f32
      %157 = vector.broadcast %cst_72 : f32 to vector<8x1xf32>
      %158 = arith.divf %156, %157 : vector<8x1xf32>
      %159 = vector.broadcast %158 : vector<8x1xf32> to vector<8x32xf32>
      %160 = arith.subf %154, %159 : vector<8x32xf32>
      %161 = arith.mulf %160, %160 : vector<8x32xf32>
      %cst_73 = arith.constant dense<0.000000e+00> : vector<8xf32>
      %162 = vector.multi_reduction <add>, %161, %cst_73 [1] : vector<8x32xf32> to vector<8xf32>
      %163 = vector.shape_cast %162 : vector<8xf32> to vector<8x1xf32>
      %cst_74 = arith.constant 3.200000e+01 : f32
      %164 = vector.broadcast %cst_74 : f32 to vector<8x1xf32>
      %165 = arith.divf %163, %164 : vector<8x1xf32>
      %166 = vector.broadcast %158 : vector<8x1xf32> to vector<8x32xf32>
      %167 = arith.subf %154, %166 : vector<8x32xf32>
      %cst_75 = arith.constant 9.99999997E-7 : f32
      %168 = vector.broadcast %cst_75 : f32 to vector<8x1xf32>
      %169 = arith.addf %165, %168 : vector<8x1xf32>
      %170 = math.rsqrt %169 : vector<8x1xf32>
      %171 = vector.broadcast %170 : vector<8x1xf32> to vector<8x32xf32>
      %172 = arith.mulf %167, %171 : vector<8x32xf32>
      %c0_76 = arith.constant 0 : index
      %c0_77 = arith.constant 0 : index
      %173 = vector.load %arg3[%c0_76, %c0_77] : memref<1x32xf32, #tpu.memory_space<vmem>>, vector<1x32xf32>
      %174 = vector.broadcast %173 : vector<1x32xf32> to vector<8x32xf32>
      %175 = arith.mulf %172, %174 : vector<8x32xf32>
      %c0_78 = arith.constant 0 : index
      %c0_79 = arith.constant 0 : index
      %176 = vector.load %arg4[%c0_78, %c0_79] : memref<1x32xf32, #tpu.memory_space<vmem>>, vector<1x32xf32>
      %177 = vector.broadcast %176 : vector<1x32xf32> to vector<8x32xf32>
      %178 = arith.addf %175, %177 : vector<8x32xf32>
      %179 = arith.truncf %178 : vector<8x32xf32> to vector<8x32xbf16>
      %c0_80 = arith.constant 0 : index
      %c0_81 = arith.constant 0 : index
      %180 = vector.load %arg5[%c0_80, %c0_81] : memref<32x96xbf16, #tpu.memory_space<vmem>>, vector<32x96xbf16>
      %cst_82 = arith.constant dense<0.000000e+00> : vector<8x96xf32>
      %181 = tpu.matmul %179, %180, %cst_82 {dimension_numbers = #tpu.dot_dimension_numbers<[1], [0], [0], [1], [0, 0, 1, 1], [], []>} : vector<8x32xbf16>, vector<32x96xbf16>, vector<8x96xf32> -> vector<8x96xf32>
      %c0_83 = arith.constant 0 : index
      %c0_84 = arith.constant 0 : index
      %182 = vector.load %arg6[%c0_83, %c0_84] : memref<1x96xf32, #tpu.memory_space<vmem>>, vector<1x96xf32>
      %183 = vector.broadcast %182 : vector<1x96xf32> to vector<8x96xf32>
      %184 = arith.addf %181, %183 : vector<8x96xf32>
      %185 = arith.truncf %184 : vector<8x96xf32> to vector<8x96xbf16>
      %186 = arith.index_cast %151 : i32 to index
      %c0_85 = arith.constant 0 : index
      %187 = vector.load %arg16[%186, %c0_85] : memref<8x96xbf16, #tpu.memory_space<vmem>>, vector<8x96xbf16>
      tpu.vector_store %arg16[%186, %c0_85], %185 {strides = array<i32>} : memref<8x96xbf16, #tpu.memory_space<vmem>>, vector<8x96xbf16>,
      %c1_i32 = arith.constant 1 : i32
    } else {
    }
    %c8_i32 = arith.constant 8 : i32
    %3 = arith.muli %arg1, %c8_i32 : i32
    %4 = tpu.assume_multiple %3, 8 : i32
    %c0 = arith.constant 0 : index
    %5 = arith.index_cast %4 : i32 to index
    %c0_1 = arith.constant 0 : index
    %6 = vector.load %arg2[%c0, %5, %c0_1] : memref<1x8x32xf32, #tpu.memory_space<vmem>>, vector<1x8x32xf32>
    %7 = vector.shape_cast %6 : vector<1x8x32xf32> to vector<8x32xf32>
    %cst = arith.constant 0.000000e+00 : f32
    %8 = vector.broadcast %cst : f32 to vector<8x32xf32>
    %9 = arith.index_cast %4 : i32 to index
    %c0_2 = arith.constant 0 : index
    %10 = vector.load %arg16[%9, %c0_2] : memref<8x96xbf16, #tpu.memory_space<vmem>>, vector<8x8xbf16>
    %c0_3 = arith.constant 0 : index
    %c32 = arith.constant 32 : index
    %11 = vector.load %arg16[%c0_3, %c32] : memref<8x96xbf16, #tpu.memory_space<vmem>>, vector<8x8xbf16>
    %c0_4 = arith.constant 0 : index
    %c64 = arith.constant 64 : index
    %12 = vector.load %arg16[%c0_4, %c64] : memref<8x96xbf16, #tpu.memory_space<vmem>>, vector<8x8xbf16>
    %cst_5 = arith.constant dense<0.000000e+00> : vector<8x8xf32>
    %13 = tpu.matmul %10, %11, %cst_5 {dimension_numbers = #tpu.dot_dimension_numbers<[1], [1], [0], [0], [0, 0, 1, 0], [], []>} : vector<8x8xbf16>, vector<8x8xbf16>, vector<8x8xf32> -> vector<8x8xf32>
    %cst_6 = arith.constant dense<0xFF800000> : vector<8xf32>
    %14 = vector.multi_reduction <maximumf>, %13, %cst_6 [1] : vector<8x8xf32> to vector<8xf32>
    %15 = vector.shape_cast %14 : vector<8xf32> to vector<8x1xf32>
    %16 = vector.broadcast %15 : vector<8x1xf32> to vector<8x8xf32>
    %17 = arith.subf %13, %16 : vector<8x8xf32>
    %18 = math.exp %17 : vector<8x8xf32>
    %cst_7 = arith.constant dense<0.000000e+00> : vector<8xf32>
    %19 = vector.multi_reduction <add>, %18, %cst_7 [1] : vector<8x8xf32> to vector<8xf32>
    %20 = vector.shape_cast %19 : vector<8xf32> to vector<8x1xf32>
    %21 = tpu.reciprocal %20 {approx = true} : vector<8x1xf32> -> vector<8x1xf32>
    %22 = vector.broadcast %21 : vector<8x1xf32> to vector<8x8xf32>
    %23 = arith.mulf %18, %22 : vector<8x8xf32>
    %24 = arith.truncf %23 : vector<8x8xf32> to vector<8x8xbf16>
    %cst_8 = arith.constant dense<0.000000e+00> : vector<8x8xf32>
    %25 = tpu.matmul %24, %12, %cst_8 {dimension_numbers = #tpu.dot_dimension_numbers<[1], [0], [0], [1], [0, 0, 1, 1], [], []>} : vector<8x8xbf16>, vector<8x8xbf16>, vector<8x8xf32> -> vector<8x8xf32>
    %26 = arith.truncf %25 : vector<8x8xf32> to vector<8x8xbf16>
    %c0_9 = arith.constant 0 : index
    %c0_10 = arith.constant 0 : index
    %27 = vector.load %arg7[%c0_9, %c0_10] : memref<32x32xbf16, #tpu.memory_space<vmem>>, vector<8x32xbf16>
    %cst_11 = arith.constant dense<0.000000e+00> : vector<8x32xf32>
    %28 = tpu.matmul %26, %27, %cst_11 {dimension_numbers = #tpu.dot_dimension_numbers<[1], [0], [0], [1], [0, 0, 1, 1], [], []>} : vector<8x8xbf16>, vector<8x32xbf16>, vector<8x32xf32> -> vector<8x32xf32>
    %29 = arith.addf %8, %28 : vector<8x32xf32>
    %30 = arith.index_cast %4 : i32 to index
    %c8 = arith.constant 8 : index
    %31 = vector.load %arg16[%30, %c8] : memref<8x96xbf16, #tpu.memory_space<vmem>>, vector<8x8xbf16>
    %c0_12 = arith.constant 0 : index
    %c40 = arith.constant 40 : index
    %32 = vector.load %arg16[%c0_12, %c40] : memref<8x96xbf16, #tpu.memory_space<vmem>>, vector<8x8xbf16>
    %c0_13 = arith.constant 0 : index
    %c72 = arith.constant 72 : index
    %33 = vector.load %arg16[%c0_13, %c72] : memref<8x96xbf16, #tpu.memory_space<vmem>>, vector<8x8xbf16>
    %cst_14 = arith.constant dense<0.000000e+00> : vector<8x8xf32>
    %34 = tpu.matmul %31, %32, %cst_14 {dimension_numbers = #tpu.dot_dimension_numbers<[1], [1], [0], [0], [0, 0, 1, 0], [], []>} : vector<8x8xbf16>, vector<8x8xbf16>, vector<8x8xf32> -> vector<8x8xf32>
    %cst_15 = arith.constant dense<0xFF800000> : vector<8xf32>
    %35 = vector.multi_reduction <maximumf>, %34, %cst_15 [1] : vector<8x8xf32> to vector<8xf32>
    %36 = vector.shape_cast %35 : vector<8xf32> to vector<8x1xf32>
    %37 = vector.broadcast %36 : vector<8x1xf32> to vector<8x8xf32>
    %38 = arith.subf %34, %37 : vector<8x8xf32>
    %39 = math.exp %38 : vector<8x8xf32>
    %cst_16 = arith.constant dense<0.000000e+00> : vector<8xf32>
    %40 = vector.multi_reduction <add>, %39, %cst_16 [1] : vector<8x8xf32> to vector<8xf32>
    %41 = vector.shape_cast %40 : vector<8xf32> to vector<8x1xf32>
    %42 = tpu.reciprocal %41 {approx = true} : vector<8x1xf32> -> vector<8x1xf32>
    %43 = vector.broadcast %42 : vector<8x1xf32> to vector<8x8xf32>
    %44 = arith.mulf %39, %43 : vector<8x8xf32>
    %45 = arith.truncf %44 : vector<8x8xf32> to vector<8x8xbf16>
    %cst_17 = arith.constant dense<0.000000e+00> : vector<8x8xf32>
    %46 = tpu.matmul %45, %33, %cst_17 {dimension_numbers = #tpu.dot_dimension_numbers<[1], [0], [0], [1], [0, 0, 1, 1], [], []>} : vector<8x8xbf16>, vector<8x8xbf16>, vector<8x8xf32> -> vector<8x8xf32>
    %47 = arith.truncf %46 : vector<8x8xf32> to vector<8x8xbf16>
    %c8_18 = arith.constant 8 : index
    %c0_19 = arith.constant 0 : index
    %48 = vector.load %arg7[%c8_18, %c0_19] : memref<32x32xbf16, #tpu.memory_space<vmem>>, vector<8x32xbf16>
    %cst_20 = arith.constant dense<0.000000e+00> : vector<8x32xf32>
    %49 = tpu.matmul %47, %48, %cst_20 {dimension_numbers = #tpu.dot_dimension_numbers<[1], [0], [0], [1], [0, 0, 1, 1], [], []>} : vector<8x8xbf16>, vector<8x32xbf16>, vector<8x32xf32> -> vector<8x32xf32>
    %50 = arith.addf %29, %49 : vector<8x32xf32>
    %51 = arith.index_cast %4 : i32 to index
    %c16 = arith.constant 16 : index
    %52 = vector.load %arg16[%51, %c16] : memref<8x96xbf16, #tpu.memory_space<vmem>>, vector<8x8xbf16>
    %c0_21 = arith.constant 0 : index
    %c48 = arith.constant 48 : index
    %53 = vector.load %arg16[%c0_21, %c48] : memref<8x96xbf16, #tpu.memory_space<vmem>>, vector<8x8xbf16>
    %c0_22 = arith.constant 0 : index
    %c80 = arith.constant 80 : index
    %54 = vector.load %arg16[%c0_22, %c80] : memref<8x96xbf16, #tpu.memory_space<vmem>>, vector<8x8xbf16>
    %cst_23 = arith.constant dense<0.000000e+00> : vector<8x8xf32>
    %55 = tpu.matmul %52, %53, %cst_23 {dimension_numbers = #tpu.dot_dimension_numbers<[1], [1], [0], [0], [0, 0, 1, 0], [], []>} : vector<8x8xbf16>, vector<8x8xbf16>, vector<8x8xf32> -> vector<8x8xf32>
    %cst_24 = arith.constant dense<0xFF800000> : vector<8xf32>
    %56 = vector.multi_reduction <maximumf>, %55, %cst_24 [1] : vector<8x8xf32> to vector<8xf32>
    %57 = vector.shape_cast %56 : vector<8xf32> to vector<8x1xf32>
    %58 = vector.broadcast %57 : vector<8x1xf32> to vector<8x8xf32>
    %59 = arith.subf %55, %58 : vector<8x8xf32>
    %60 = math.exp %59 : vector<8x8xf32>
    %cst_25 = arith.constant dense<0.000000e+00> : vector<8xf32>
    %61 = vector.multi_reduction <add>, %60, %cst_25 [1] : vector<8x8xf32> to vector<8xf32>
    %62 = vector.shape_cast %61 : vector<8xf32> to vector<8x1xf32>
    %63 = tpu.reciprocal %62 {approx = true} : vector<8x1xf32> -> vector<8x1xf32>
    %64 = vector.broadcast %63 : vector<8x1xf32> to vector<8x8xf32>
    %65 = arith.mulf %60, %64 : vector<8x8xf32>
    %66 = arith.truncf %65 : vector<8x8xf32> to vector<8x8xbf16>
    %cst_26 = arith.constant dense<0.000000e+00> : vector<8x8xf32>
    %67 = tpu.matmul %66, %54, %cst_26 {dimension_numbers = #tpu.dot_dimension_numbers<[1], [0], [0], [1], [0, 0, 1, 1], [], []>} : vector<8x8xbf16>, vector<8x8xbf16>, vector<8x8xf32> -> vector<8x8xf32>
    %68 = arith.truncf %67 : vector<8x8xf32> to vector<8x8xbf16>
    %c16_27 = arith.constant 16 : index
    %c0_28 = arith.constant 0 : index
    %69 = vector.load %arg7[%c16_27, %c0_28] : memref<32x32xbf16, #tpu.memory_space<vmem>>, vector<8x32xbf16>
    %cst_29 = arith.constant dense<0.000000e+00> : vector<8x32xf32>
    %70 = tpu.matmul %68, %69, %cst_29 {dimension_numbers = #tpu.dot_dimension_numbers<[1], [0], [0], [1], [0, 0, 1, 1], [], []>} : vector<8x8xbf16>, vector<8x32xbf16>, vector<8x32xf32> -> vector<8x32xf32>
    %71 = arith.addf %50, %70 : vector<8x32xf32>
    %72 = arith.index_cast %4 : i32 to index
    %c24 = arith.constant 24 : index
    %73 = vector.load %arg16[%72, %c24] : memref<8x96xbf16, #tpu.memory_space<vmem>>, vector<8x8xbf16>
    %c0_30 = arith.constant 0 : index
    %c56 = arith.constant 56 : index
    %74 = vector.load %arg16[%c0_30, %c56] : memref<8x96xbf16, #tpu.memory_space<vmem>>, vector<8x8xbf16>
    %c0_31 = arith.constant 0 : index
    %c88 = arith.constant 88 : index
    %75 = vector.load %arg16[%c0_31, %c88] : memref<8x96xbf16, #tpu.memory_space<vmem>>, vector<8x8xbf16>
    %cst_32 = arith.constant dense<0.000000e+00> : vector<8x8xf32>
    %76 = tpu.matmul %73, %74, %cst_32 {dimension_numbers = #tpu.dot_dimension_numbers<[1], [1], [0], [0], [0, 0, 1, 0], [], []>} : vector<8x8xbf16>, vector<8x8xbf16>, vector<8x8xf32> -> vector<8x8xf32>
    %cst_33 = arith.constant dense<0xFF800000> : vector<8xf32>
    %77 = vector.multi_reduction <maximumf>, %76, %cst_33 [1] : vector<8x8xf32> to vector<8xf32>
    %78 = vector.shape_cast %77 : vector<8xf32> to vector<8x1xf32>
    %79 = vector.broadcast %78 : vector<8x1xf32> to vector<8x8xf32>
    %80 = arith.subf %76, %79 : vector<8x8xf32>
    %81 = math.exp %80 : vector<8x8xf32>
    %cst_34 = arith.constant dense<0.000000e+00> : vector<8xf32>
    %82 = vector.multi_reduction <add>, %81, %cst_34 [1] : vector<8x8xf32> to vector<8xf32>
    %83 = vector.shape_cast %82 : vector<8xf32> to vector<8x1xf32>
    %84 = tpu.reciprocal %83 {approx = true} : vector<8x1xf32> -> vector<8x1xf32>
    %85 = vector.broadcast %84 : vector<8x1xf32> to vector<8x8xf32>
    %86 = arith.mulf %81, %85 : vector<8x8xf32>
    %87 = arith.truncf %86 : vector<8x8xf32> to vector<8x8xbf16>
    %cst_35 = arith.constant dense<0.000000e+00> : vector<8x8xf32>
    %88 = tpu.matmul %87, %75, %cst_35 {dimension_numbers = #tpu.dot_dimension_numbers<[1], [0], [0], [1], [0, 0, 1, 1], [], []>} : vector<8x8xbf16>, vector<8x8xbf16>, vector<8x8xf32> -> vector<8x8xf32>
    %89 = arith.truncf %88 : vector<8x8xf32> to vector<8x8xbf16>
    %c24_36 = arith.constant 24 : index
    %c0_37 = arith.constant 0 : index
    %90 = vector.load %arg7[%c24_36, %c0_37] : memref<32x32xbf16, #tpu.memory_space<vmem>>, vector<8x32xbf16>
    %cst_38 = arith.constant dense<0.000000e+00> : vector<8x32xf32>
    %91 = tpu.matmul %89, %90, %cst_38 {dimension_numbers = #tpu.dot_dimension_numbers<[1], [0], [0], [1], [0, 0, 1, 1], [], []>} : vector<8x8xbf16>, vector<8x32xbf16>, vector<8x32xf32> -> vector<8x32xf32>
    %92 = arith.addf %71, %91 : vector<8x32xf32>
    %93 = arith.addf %7, %92 : vector<8x32xf32>
    %c0_39 = arith.constant 0 : index
    %c0_40 = arith.constant 0 : index
    %94 = vector.load %arg8[%c0_39, %c0_40] : memref<1x32xf32, #tpu.memory_space<vmem>>, vector<1x32xf32>
    %95 = vector.broadcast %94 : vector<1x32xf32> to vector<8x32xf32>
    %96 = arith.addf %93, %95 : vector<8x32xf32>
    %cst_41 = arith.constant dense<0.000000e+00> : vector<8xf32>
    %97 = vector.multi_reduction <add>, %96, %cst_41 [1] : vector<8x32xf32> to vector<8xf32>
    %98 = vector.shape_cast %97 : vector<8xf32> to vector<8x1xf32>
    %cst_42 = arith.constant 3.200000e+01 : f32
    %99 = vector.broadcast %cst_42 : f32 to vector<8x1xf32>
    %100 = arith.divf %98, %99 : vector<8x1xf32>
    %101 = vector.broadcast %100 : vector<8x1xf32> to vector<8x32xf32>
    %102 = arith.subf %96, %101 : vector<8x32xf32>
    %103 = arith.mulf %102, %102 : vector<8x32xf32>
    %cst_43 = arith.constant dense<0.000000e+00> : vector<8xf32>
    %104 = vector.multi_reduction <add>, %103, %cst_43 [1] : vector<8x32xf32> to vector<8xf32>
    %105 = vector.shape_cast %104 : vector<8xf32> to vector<8x1xf32>
    %cst_44 = arith.constant 3.200000e+01 : f32
    %106 = vector.broadcast %cst_44 : f32 to vector<8x1xf32>
    %107 = arith.divf %105, %106 : vector<8x1xf32>
    %108 = vector.broadcast %100 : vector<8x1xf32> to vector<8x32xf32>
    %109 = arith.subf %96, %108 : vector<8x32xf32>
    %cst_45 = arith.constant 9.99999997E-7 : f32
    %110 = vector.broadcast %cst_45 : f32 to vector<8x1xf32>
    %111 = arith.addf %107, %110 : vector<8x1xf32>
    %112 = math.rsqrt %111 : vector<8x1xf32>
    %113 = vector.broadcast %112 : vector<8x1xf32> to vector<8x32xf32>
    %114 = arith.mulf %109, %113 : vector<8x32xf32>
    %c0_46 = arith.constant 0 : index
    %c0_47 = arith.constant 0 : index
    %115 = vector.load %arg9[%c0_46, %c0_47] : memref<1x32xf32, #tpu.memory_space<vmem>>, vector<1x32xf32>
    %116 = vector.broadcast %115 : vector<1x32xf32> to vector<8x32xf32>
    %117 = arith.mulf %114, %116 : vector<8x32xf32>
    %c0_48 = arith.constant 0 : index
    %c0_49 = arith.constant 0 : index
    %118 = vector.load %arg10[%c0_48, %c0_49] : memref<1x32xf32, #tpu.memory_space<vmem>>, vector<1x32xf32>
    %119 = vector.broadcast %118 : vector<1x32xf32> to vector<8x32xf32>
    %120 = arith.addf %117, %119 : vector<8x32xf32>
    %121 = arith.truncf %120 : vector<8x32xf32> to vector<8x32xbf16>
    %c0_50 = arith.constant 0 : index
    %c0_51 = arith.constant 0 : index
    %122 = vector.load %arg11[%c0_50, %c0_51] : memref<32x64xbf16, #tpu.memory_space<vmem>>, vector<32x64xbf16>
    %cst_52 = arith.constant dense<0.000000e+00> : vector<8x64xf32>
    %123 = tpu.matmul %121, %122, %cst_52 {dimension_numbers = #tpu.dot_dimension_numbers<[1], [0], [0], [1], [0, 0, 1, 1], [], []>} : vector<8x32xbf16>, vector<32x64xbf16>, vector<8x64xf32> -> vector<8x64xf32>
    %c0_53 = arith.constant 0 : index
    %c0_54 = arith.constant 0 : index
    %124 = vector.load %arg12[%c0_53, %c0_54] : memref<1x64xf32, #tpu.memory_space<vmem>>, vector<1x64xf32>
    %125 = vector.broadcast %124 : vector<1x64xf32> to vector<8x64xf32>
    %126 = arith.addf %123, %125 : vector<8x64xf32>
    %cst_55 = arith.constant 5.000000e-01 : f32
    %127 = vector.broadcast %cst_55 : f32 to vector<8x64xf32>
    %128 = arith.mulf %127, %126 : vector<8x64xf32>
    %cst_56 = arith.constant 4.471500e-02 : f32
    %129 = vector.broadcast %cst_56 : f32 to vector<8x64xf32>
    %130 = arith.mulf %129, %126 : vector<8x64xf32>
    %131 = arith.mulf %130, %126 : vector<8x64xf32>
    %132 = arith.mulf %131, %126 : vector<8x64xf32>
    %133 = arith.addf %126, %132 : vector<8x64xf32>
    %cst_57 = arith.constant 0.797884583 : f32
    %134 = vector.broadcast %cst_57 : f32 to vector<8x64xf32>
    %135 = arith.mulf %134, %133 : vector<8x64xf32>
    %136 = math.tanh %135 : vector<8x64xf32>
    %cst_58 = arith.constant 1.000000e+00 : f32
    %137 = vector.broadcast %cst_58 : f32 to vector<8x64xf32>
    %138 = arith.addf %137, %136 : vector<8x64xf32>
    %139 = arith.mulf %128, %138 : vector<8x64xf32>
    %140 = arith.truncf %139 : vector<8x64xf32> to vector<8x64xbf16>
    %c0_59 = arith.constant 0 : index
    %c0_60 = arith.constant 0 : index
    %141 = vector.load %arg13[%c0_59, %c0_60] : memref<64x32xbf16, #tpu.memory_space<vmem>>, vector<64x32xbf16>
    %cst_61 = arith.constant dense<0.000000e+00> : vector<8x32xf32>
    %142 = tpu.matmul %140, %141, %cst_61 {dimension_numbers = #tpu.dot_dimension_numbers<[1], [0], [0], [1], [0, 0, 1, 1], [], []>} : vector<8x64xbf16>, vector<64x32xbf16>, vector<8x32xf32> -> vector<8x32xf32>
    %c0_62 = arith.constant 0 : index
    %c0_63 = arith.constant 0 : index
    %143 = vector.load %arg14[%c0_62, %c0_63] : memref<1x32xf32, #tpu.memory_space<vmem>>, vector<1x32xf32>
    %144 = vector.broadcast %143 : vector<1x32xf32> to vector<8x32xf32>
    %145 = arith.addf %142, %144 : vector<8x32xf32>
    %146 = arith.addf %96, %145 : vector<8x32xf32>
    %c0_64 = arith.constant 0 : index
    %c0_65 = arith.constant 0 : index
    %c0_66 = arith.constant 0 : index
    %147 = vector.load %arg15[%c0_64, %c0_65, %c0_66] : memref<1x8x32xf32, #tpu.memory_space<vmem>>, vector<1x8x32xf32>
    %148 = vector.shape_cast %147 : vector<1x8x32xf32> to vector<8x32xf32>
    %149 = vector.shape_cast %146 : vector<8x32xf32> to vector<1x8x32xf32>
    tpu.vector_store %arg15[%c0_64, %c0_65, %c0_66], %149 {strides = array<i32>} : memref<1x8x32xf32, #tpu.memory_space<vmem>>, vector<1x8x32xf32>,
    return
  }
  func.func @transform_0(%arg0: i32, %arg1: i32) -> (i32, i32, i32) {
    %c0_i32 = arith.constant 0 : i32
    %c0_i32_0 = arith.constant 0 : i32
    %c0_i32_1 = arith.constant 0 : i32
    return %arg0, %c0_i32, %c0_i32_0 : i32, i32, i32
  }
  func.func @transform_1(%arg0: i32, %arg1: i32) -> (i32, i32) {
    %c0_i32 = arith.constant 0 : i32
    %c0_i32_0 = arith.constant 0 : i32
    %c0_i32_1 = arith.constant 0 : i32
    return %c0_i32, %c0_i32_0 : i32, i32
  }
  func.func @transform_2(%arg0: i32, %arg1: i32) -> (i32, i32) {
    %c0_i32 = arith.constant 0 : i32
    %c0_i32_0 = arith.constant 0 : i32
    %c0_i32_1 = arith.constant 0 : i32
    return %c0_i32, %c0_i32_0 : i32, i32
  }
  func.func @transform_3(%arg0: i32, %arg1: i32) -> (i32, i32) {
    %c0_i32 = arith.constant 0 : i32
    %c0_i32_0 = arith.constant 0 : i32
    %c0_i32_1 = arith.constant 0 : i32
    return %c0_i32, %c0_i32_0 : i32, i32
  }
  func.func @transform_4(%arg0: i32, %arg1: i32) -> (i32, i32) {
    %c0_i32 = arith.constant 0 : i32
    %c0_i32_0 = arith.constant 0 : i32
    %c0_i32_1 = arith.constant 0 : i32
    return %c0_i32, %c0_i32_0 : i32, i32
  }
  func.func @transform_5(%arg0: i32, %arg1: i32) -> (i32, i32) {
    %c0_i32 = arith.constant 0 : i32
    %c0_i32_0 = arith.constant 0 : i32
    %c0_i32_1 = arith.constant 0 : i32
    return %c0_i32, %c0_i32_0 : i32, i32
  }
  func.func @transform_6(%arg0: i32, %arg1: i32) -> (i32, i32) {
    %c0_i32 = arith.constant 0 : i32
    %c0_i32_0 = arith.constant 0 : i32
    %c0_i32_1 = arith.constant 0 : i32
    return %c0_i32, %c0_i32_0 : i32, i32
  }
  func.func @transform_7(%arg0: i32, %arg1: i32) -> (i32, i32) {
    %c0_i32 = arith.constant 0 : i32
    %c0_i32_0 = arith.constant 0 : i32
    %c0_i32_1 = arith.constant 0 : i32
    return %c0_i32, %c0_i32_0 : i32, i32
  }
  func.func @transform_8(%arg0: i32, %arg1: i32) -> (i32, i32) {
    %c0_i32 = arith.constant 0 : i32
    %c0_i32_0 = arith.constant 0 : i32
    %c0_i32_1 = arith.constant 0 : i32
    return %c0_i32, %c0_i32_0 : i32, i32
  }
  func.func @transform_9(%arg0: i32, %arg1: i32) -> (i32, i32) {
    %c0_i32 = arith.constant 0 : i32
    %c0_i32_0 = arith.constant 0 : i32
    %c0_i32_1 = arith.constant 0 : i32
    return %c0_i32, %c0_i32_0 : i32, i32
  }
  func.func @transform_10(%arg0: i32, %arg1: i32) -> (i32, i32) {
    %c0_i32 = arith.constant 0 : i32
    %c0_i32_0 = arith.constant 0 : i32
    %c0_i32_1 = arith.constant 0 : i32
    return %c0_i32, %c0_i32_0 : i32, i32
  }
  func.func @transform_11(%arg0: i32, %arg1: i32) -> (i32, i32) {
    %c0_i32 = arith.constant 0 : i32
    %c0_i32_0 = arith.constant 0 : i32
    %c0_i32_1 = arith.constant 0 : i32
    return %c0_i32, %c0_i32_0 : i32, i32
  }
  func.func @transform_12(%arg0: i32, %arg1: i32) -> (i32, i32) {
    %c0_i32 = arith.constant 0 : i32
    %c0_i32_0 = arith.constant 0 : i32
    %c0_i32_1 = arith.constant 0 : i32
    return %c0_i32, %c0_i32_0 : i32, i32
  }
  func.func @transform_13(%arg0: i32, %arg1: i32) -> (i32, i32, i32) {
    %c0_i32 = arith.constant 0 : i32
    %c0_i32_0 = arith.constant 0 : i32
    return %arg0, %arg1, %c0_i32 : i32, i32, i32
  }
}

module attributes {stable_mosaic.version = 11 : i64} {
  func.func @encoder_layer_kernel(%arg0: i32, %arg1: i32, %arg2: memref<1x8x32xf32, #tpu.memory_space<vmem>>, %arg3: memref<1x32xf32, #tpu.memory_space<vmem>>, %arg4: memref<1x32xf32, #tpu.memory_space<vmem>>, %arg5: memref<32x96xbf16, #tpu.memory_space<vmem>>, %arg6: memref<1x96xf32, #tpu.memory_space<vmem>>, %arg7: memref<32x32xbf16, #tpu.memory_space<vmem>>, %arg8: memref<1x32xf32, #tpu.memory_space<vmem>>, %arg9: memref<1x32xf32, #tpu.memory_space<vmem>>, %arg10: memref<1x32xf32, #tpu.memory_space<vmem>>, %arg11: memref<32x64xbf16, #tpu.memory_space<vmem>>, %arg12: memref<1x64xf32, #tpu.memory_space<vmem>>, %arg13: memref<64x32xbf16, #tpu.memory_space<vmem>>, %arg14: memref<1x32xf32, #tpu.memory_space<vmem>>, %arg15: memref<1x8x32xf32, #tpu.memory_space<vmem>>, %arg16: memref<8x96xbf16, #tpu.memory_space<vmem>>) attributes {dimension_semantics = [#tpu.dimension_semantics<parallel>, #tpu.dimension_semantics<arbitrary>], iteration_bounds = array<i64: 2, 1>, scalar_prefetch = 0 : i64, scratch_operands = 1 : i64, tpu.core_type = #tpu.core_type<tc>, window_params = [{transform_indices = @transform_0, window_bounds = array<i64: 1, 8, 32>}, {pipeline_mode = #tpu.pipeline_mode<synchronous>, transform_indices = @transform_1, window_bounds = array<i64: 1, 32>}, {pipeline_mode = #tpu.pipeline_mode<synchronous>, transform_indices = @transform_2, window_bounds = array<i64: 1, 32>}, {pipeline_mode = #tpu.pipeline_mode<synchronous>, transform_indices = @transform_3, window_bounds = array<i64: 32, 96>}, {pipeline_mode = #tpu.pipeline_mode<synchronous>, transform_indices = @transform_4, window_bounds = array<i64: 1, 96>}, {pipeline_mode = #tpu.pipeline_mode<synchronous>, transform_indices = @transform_5, window_bounds = array<i64: 32, 32>}, {pipeline_mode = #tpu.pipeline_mode<synchronous>, transform_indices = @transform_6, window_bounds = array<i64: 1, 32>}, {pipeline_mode = #tpu.pipeline_mode<synchronous>, transform_indices = @transform_7, window_bounds = array<i64: 1, 32>}, {pipeline_mode = #tpu.pipeline_mode<synchronous>, transform_indices = @transform_8, window_bounds = array<i64: 1, 32>}, {pipeline_mode = #tpu.pipeline_mode<synchronous>, transform_indices = @transform_9, window_bounds = array<i64: 32, 64>}, {pipeline_mode = #tpu.pipeline_mode<synchronous>, transform_indices = @transform_10, window_bounds = array<i64: 1, 64>}, {pipeline_mode = #tpu.pipeline_mode<synchronous>, transform_indices = @transform_11, window_bounds = array<i64: 64, 32>}, {pipeline_mode = #tpu.pipeline_mode<synchronous>, transform_indices = @transform_12, window_bounds = array<i64: 1, 32>}, {transform_indices = @transform_13, window_bounds = array<i64: 1, 8, 32>}]} {
    %c0_i32 = arith.constant 0 : i32
    %0 = arith.cmpi eq, %arg1, %c0_i32 : i32
    %1 = arith.extui %0 : i1 to i32
    %c0_i32_0 = arith.constant 0 : i32
    %2 = arith.cmpi ne, %1, %c0_i32_0 : i32
    scf.if %2 {
      %c0_i32_67 = arith.constant 0 : i32
      %c8_i32_68 = arith.constant 8 : i32
      %150 = arith.muli %c0_i32_67, %c8_i32_68 : i32
      %151 = tpu.assume_multiple %150, 8 : i32
      %c0_69 = arith.constant 0 : index
      %152 = arith.index_cast %151 : i32 to index
      %c0_70 = arith.constant 0 : index
      %153 = vector.load %arg2[%c0_69, %152, %c0_70] : memref<1x8x32xf32, #tpu.memory_space<vmem>>, vector<1x8x32xf32>
      %154 = vector.shape_cast %153 : vector<1x8x32xf32> to vector<8x32xf32>
      %cst_71 = arith.constant dense<0.000000e+00> : vector<8xf32>
      %155 = vector.multi_reduction <add>, %154, %cst_71 [1] : vector<8x32xf32> to vector<8xf32>
      %156 = vector.shape_cast %155 : vector<8xf32> to vector<8x1xf32>
      %cst_72 = arith.constant 3.200000e+01 : f32
      %157 = vector.broadcast %cst_72 : f32 to vector<8x1xf32>
      %158 = arith.divf %156, %157 : vector<8x1xf32>
      %159 = vector.broadcast %158 : vector<8x1xf32> to vector<8x32xf32>
      %160 = arith.subf %154, %159 : vector<8x32xf32>
      %161 = arith.mulf %160, %160 : vector<8x32xf32>
      %cst_73 = arith.constant dense<0.000000e+00> : vector<8xf32>
      %162 = vector.multi_reduction <add>, %161, %cst_73 [1] : vector<8x32xf32> to vector<8xf32>
      %163 = vector.shape_cast %162 : vector<8xf32> to vector<8x1xf32>
      %cst_74 = arith.constant 3.200000e+01 : f32
      %164 = vector.broadcast %cst_74 : f32 to vector<8x1xf32>
      %165 = arith.divf %163, %164 : vector<8x1xf32>
      %166 = vector.broadcast %158 : vector<8x1xf32> to vector<8x32xf32>
      %167 = arith.subf %154, %166 : vector<8x32xf32>
      %cst_75 = arith.constant 9.99999997E-7 : f32
      %168 = vector.broadcast %cst_75 : f32 to vector<8x1xf32>
      %169 = arith.addf %165, %168 : vector<8x1xf32>
      %170 = math.rsqrt %169 : vector<8x1xf32>
      %171 = vector.broadcast %170 : vector<8x1xf32> to vector<8x32xf32>
      %172 = arith.mulf %167, %171 : vector<8x32xf32>
      %c0_76 = arith.constant 0 : index
      %c0_77 = arith.constant 0 : index
      %173 = vector.load %arg3[%c0_76, %c0_77] : memref<1x32xf32, #tpu.memory_space<vmem>>, vector<1x32xf32>
      %174 = vector.broadcast %173 : vector<1x32xf32> to vector<8x32xf32>
      %175 = arith.mulf %172, %174 : vector<8x32xf32>
      %c0_78 = arith.constant 0 : index
      %c0_79 = arith.constant 0 : index
      %176 = vector.load %arg4[%c0_78, %c0_79] : memref<1x32xf32, #tpu.memory_space<vmem>>, vector<1x32xf32>
      %177 = vector.broadcast %176 : vector<1x32xf32> to vector<8x32xf32>
      %178 = arith.addf %175, %177 : vector<8x32xf32>
      %179 = arith.truncf %178 : vector<8x32xf32> to vector<8x32xbf16>
      %c0_80 = arith.constant 0 : index
      %c0_81 = arith.constant 0 : index
      %180 = vector.load %arg5[%c0_80, %c0_81] : memref<32x96xbf16, #tpu.memory_space<vmem>>, vector<32x96xbf16>
      %cst_82 = arith.constant dense<0.000000e+00> : vector<8x96xf32>
      %181 = tpu.matmul %179, %180, %cst_82 {dimension_numbers = #tpu.dot_dimension_numbers<[1], [0], [0], [1], [0, 0, 1, 1], [], []>} : vector<8x32xbf16>, vector<32x96xbf16>, vector<8x96xf32> -> vector<8x96xf32>
      %c0_83 = arith.constant 0 : index
      %c0_84 = arith.constant 0 : index
      %182 = vector.load %arg6[%c0_83, %c0_84] : memref<1x96xf32, #tpu.memory_space<vmem>>, vector<1x96xf32>
      %183 = vector.broadcast %182 : vector<1x96xf32> to vector<8x96xf32>
      %184 = arith.addf %181, %183 : vector<8x96xf32>
      %185 = arith.truncf %184 : vector<8x96xf32> to vector<8x96xbf16>
      %186 = arith.index_cast %151 : i32 to index
      %c0_85 = arith.constant 0 : index
      %187 = vector.load %arg16[%186, %c0_85] : memref<8x96xbf16, #tpu.memory_space<vmem>>, vector<8x96xbf16>
      tpu.vector_store %arg16[%186, %c0_85], %185 {strides = array<i32>} : memref<8x96xbf16, #tpu.memory_space<vmem>>, vector<8x96xbf16>,
      %c1_i32 = arith.constant 1 : i32
    } else {
    }
    %c8_i32 = arith.constant 8 : i32
    %3 = arith.muli %arg1, %c8_i32 : i32
    %4 = tpu.assume_multiple %3, 8 : i32
    %c0 = arith.constant 0 : index
    %5 = arith.index_cast %4 : i32 to index
    %c0_1 = arith.constant 0 : index
    %6 = vector.load %arg2[%c0, %5, %c0_1] : memref<1x8x32xf32, #tpu.memory_space<vmem>>, vector<1x8x32xf32>
    %7 = vector.shape_cast %6 : vector<1x8x32xf32> to vector<8x32xf32>
    %cst = arith.constant 0.000000e+00 : f32
    %8 = vector.broadcast %cst : f32 to vector<8x32xf32>
    %9 = arith.index_cast %4 : i32 to index
    %c0_2 = arith.constant 0 : index
    %10 = vector.load %arg16[%9, %c0_2] : memref<8x96xbf16, #tpu.memory_space<vmem>>, vector<8x8xbf16>
    %c0_3 = arith.constant 0 : index
    %c32 = arith.constant 32 : index
    %11 = vector.load %arg16[%c0_3, %c32] : memref<8x96xbf16, #tpu.memory_space<vmem>>, vector<8x8xbf16>
    %c0_4 = arith.constant 0 : index
    %c64 = arith.constant 64 : index
    %12 = vector.load %arg16[%c0_4, %c64] : memref<8x96xbf16, #tpu.memory_space<vmem>>, vector<8x8xbf16>
    %cst_5 = arith.constant dense<0.000000e+00> : vector<8x8xf32>
    %13 = tpu.matmul %10, %11, %cst_5 {dimension_numbers = #tpu.dot_dimension_numbers<[1], [1], [0], [0], [0, 0, 1, 0], [], []>} : vector<8x8xbf16>, vector<8x8xbf16>, vector<8x8xf32> -> vector<8x8xf32>
    %cst_6 = arith.constant dense<0xFF800000> : vector<8xf32>
    %14 = vector.multi_reduction <maximumf>, %13, %cst_6 [1] : vector<8x8xf32> to vector<8xf32>
    %15 = vector.shape_cast %14 : vector<8xf32> to vector<8x1xf32>
    %16 = vector.broadcast %15 : vector<8x1xf32> to vector<8x8xf32>
    %17 = arith.subf %13, %16 : vector<8x8xf32>
    %18 = math.exp %17 : vector<8x8xf32>
    %cst_7 = arith.constant dense<0.000000e+00> : vector<8xf32>
    %19 = vector.multi_reduction <add>, %18, %cst_7 [1] : vector<8x8xf32> to vector<8xf32>
    %20 = vector.shape_cast %19 : vector<8xf32> to vector<8x1xf32>
    %21 = tpu.reciprocal %20 {approx = true} : vector<8x1xf32> -> vector<8x1xf32>
    %22 = vector.broadcast %21 : vector<8x1xf32> to vector<8x8xf32>
    %23 = arith.mulf %18, %22 : vector<8x8xf32>
    %24 = arith.truncf %23 : vector<8x8xf32> to vector<8x8xbf16>
    %cst_8 = arith.constant dense<0.000000e+00> : vector<8x8xf32>
    %25 = tpu.matmul %24, %12, %cst_8 {dimension_numbers = #tpu.dot_dimension_numbers<[1], [0], [0], [1], [0, 0, 1, 1], [], []>} : vector<8x8xbf16>, vector<8x8xbf16>, vector<8x8xf32> -> vector<8x8xf32>
    %26 = arith.truncf %25 : vector<8x8xf32> to vector<8x8xbf16>
    %c0_9 = arith.constant 0 : index
    %c0_10 = arith.constant 0 : index
    %27 = vector.load %arg7[%c0_9, %c0_10] : memref<32x32xbf16, #tpu.memory_space<vmem>>, vector<8x32xbf16>
    %cst_11 = arith.constant dense<0.000000e+00> : vector<8x32xf32>
    %28 = tpu.matmul %26, %27, %cst_11 {dimension_numbers = #tpu.dot_dimension_numbers<[1], [0], [0], [1], [0, 0, 1, 1], [], []>} : vector<8x8xbf16>, vector<8x32xbf16>, vector<8x32xf32> -> vector<8x32xf32>
    %29 = arith.addf %8, %28 : vector<8x32xf32>
    %30 = arith.index_cast %4 : i32 to index
    %c8 = arith.constant 8 : index
    %31 = vector.load %arg16[%30, %c8] : memref<8x96xbf16, #tpu.memory_space<vmem>>, vector<8x8xbf16>
    %c0_12 = arith.constant 0 : index
    %c40 = arith.constant 40 : index
    %32 = vector.load %arg16[%c0_12, %c40] : memref<8x96xbf16, #tpu.memory_space<vmem>>, vector<8x8xbf16>
    %c0_13 = arith.constant 0 : index
    %c72 = arith.constant 72 : index
    %33 = vector.load %arg16[%c0_13, %c72] : memref<8x96xbf16, #tpu.memory_space<vmem>>, vector<8x8xbf16>
    %cst_14 = arith.constant dense<0.000000e+00> : vector<8x8xf32>
    %34 = tpu.matmul %31, %32, %cst_14 {dimension_numbers = #tpu.dot_dimension_numbers<[1], [1], [0], [0], [0, 0, 1, 0], [], []>} : vector<8x8xbf16>, vector<8x8xbf16>, vector<8x8xf32> -> vector<8x8xf32>
    %cst_15 = arith.constant dense<0xFF800000> : vector<8xf32>
    %35 = vector.multi_reduction <maximumf>, %34, %cst_15 [1] : vector<8x8xf32> to vector<8xf32>
    %36 = vector.shape_cast %35 : vector<8xf32> to vector<8x1xf32>
    %37 = vector.broadcast %36 : vector<8x1xf32> to vector<8x8xf32>
    %38 = arith.subf %34, %37 : vector<8x8xf32>
    %39 = math.exp %38 : vector<8x8xf32>
    %cst_16 = arith.constant dense<0.000000e+00> : vector<8xf32>
    %40 = vector.multi_reduction <add>, %39, %cst_16 [1] : vector<8x8xf32> to vector<8xf32>
    %41 = vector.shape_cast %40 : vector<8xf32> to vector<8x1xf32>
    %42 = tpu.reciprocal %41 {approx = true} : vector<8x1xf32> -> vector<8x1xf32>
    %43 = vector.broadcast %42 : vector<8x1xf32> to vector<8x8xf32>
    %44 = arith.mulf %39, %43 : vector<8x8xf32>
    %45 = arith.truncf %44 : vector<8x8xf32> to vector<8x8xbf16>
    %cst_17 = arith.constant dense<0.000000e+00> : vector<8x8xf32>
    %46 = tpu.matmul %45, %33, %cst_17 {dimension_numbers = #tpu.dot_dimension_numbers<[1], [0], [0], [1], [0, 0, 1, 1], [], []>} : vector<8x8xbf16>, vector<8x8xbf16>, vector<8x8xf32> -> vector<8x8xf32>
    %47 = arith.truncf %46 : vector<8x8xf32> to vector<8x8xbf16>
    %c8_18 = arith.constant 8 : index
    %c0_19 = arith.constant 0 : index
    %48 = vector.load %arg7[%c8_18, %c0_19] : memref<32x32xbf16, #tpu.memory_space<vmem>>, vector<8x32xbf16>
    %cst_20 = arith.constant dense<0.000000e+00> : vector<8x32xf32>
    %49 = tpu.matmul %47, %48, %cst_20 {dimension_numbers = #tpu.dot_dimension_numbers<[1], [0], [0], [1], [0, 0, 1, 1], [], []>} : vector<8x8xbf16>, vector<8x32xbf16>, vector<8x32xf32> -> vector<8x32xf32>
    %50 = arith.addf %29, %49 : vector<8x32xf32>
    %51 = arith.index_cast %4 : i32 to index
    %c16 = arith.constant 16 : index
    %52 = vector.load %arg16[%51, %c16] : memref<8x96xbf16, #tpu.memory_space<vmem>>, vector<8x8xbf16>
    %c0_21 = arith.constant 0 : index
    %c48 = arith.constant 48 : index
    %53 = vector.load %arg16[%c0_21, %c48] : memref<8x96xbf16, #tpu.memory_space<vmem>>, vector<8x8xbf16>
    %c0_22 = arith.constant 0 : index
    %c80 = arith.constant 80 : index
    %54 = vector.load %arg16[%c0_22, %c80] : memref<8x96xbf16, #tpu.memory_space<vmem>>, vector<8x8xbf16>
    %cst_23 = arith.constant dense<0.000000e+00> : vector<8x8xf32>
    %55 = tpu.matmul %52, %53, %cst_23 {dimension_numbers = #tpu.dot_dimension_numbers<[1], [1], [0], [0], [0, 0, 1, 0], [], []>} : vector<8x8xbf16>, vector<8x8xbf16>, vector<8x8xf32> -> vector<8x8xf32>
    %cst_24 = arith.constant dense<0xFF800000> : vector<8xf32>
    %56 = vector.multi_reduction <maximumf>, %55, %cst_24 [1] : vector<8x8xf32> to vector<8xf32>
    %57 = vector.shape_cast %56 : vector<8xf32> to vector<8x1xf32>
    %58 = vector.broadcast %57 : vector<8x1xf32> to vector<8x8xf32>
    %59 = arith.subf %55, %58 : vector<8x8xf32>
    %60 = math.exp %59 : vector<8x8xf32>
    %cst_25 = arith.constant dense<0.000000e+00> : vector<8xf32>
    %61 = vector.multi_reduction <add>, %60, %cst_25 [1] : vector<8x8xf32> to vector<8xf32>
    %62 = vector.shape_cast %61 : vector<8xf32> to vector<8x1xf32>
    %63 = tpu.reciprocal %62 {approx = true} : vector<8x1xf32> -> vector<8x1xf32>
    %64 = vector.broadcast %63 : vector<8x1xf32> to vector<8x8xf32>
    %65 = arith.mulf %60, %64 : vector<8x8xf32>
    %66 = arith.truncf %65 : vector<8x8xf32> to vector<8x8xbf16>
    %cst_26 = arith.constant dense<0.000000e+00> : vector<8x8xf32>
    %67 = tpu.matmul %66, %54, %cst_26 {dimension_numbers = #tpu.dot_dimension_numbers<[1], [0], [0], [1], [0, 0, 1, 1], [], []>} : vector<8x8xbf16>, vector<8x8xbf16>, vector<8x8xf32> -> vector<8x8xf32>
    %68 = arith.truncf %67 : vector<8x8xf32> to vector<8x8xbf16>
    %c16_27 = arith.constant 16 : index
    %c0_28 = arith.constant 0 : index
    %69 = vector.load %arg7[%c16_27, %c0_28] : memref<32x32xbf16, #tpu.memory_space<vmem>>, vector<8x32xbf16>
    %cst_29 = arith.constant dense<0.000000e+00> : vector<8x32xf32>
    %70 = tpu.matmul %68, %69, %cst_29 {dimension_numbers = #tpu.dot_dimension_numbers<[1], [0], [0], [1], [0, 0, 1, 1], [], []>} : vector<8x8xbf16>, vector<8x32xbf16>, vector<8x32xf32> -> vector<8x32xf32>
    %71 = arith.addf %50, %70 : vector<8x32xf32>
    %72 = arith.index_cast %4 : i32 to index
    %c24 = arith.constant 24 : index
    %73 = vector.load %arg16[%72, %c24] : memref<8x96xbf16, #tpu.memory_space<vmem>>, vector<8x8xbf16>
    %c0_30 = arith.constant 0 : index
    %c56 = arith.constant 56 : index
    %74 = vector.load %arg16[%c0_30, %c56] : memref<8x96xbf16, #tpu.memory_space<vmem>>, vector<8x8xbf16>
    %c0_31 = arith.constant 0 : index
    %c88 = arith.constant 88 : index
    %75 = vector.load %arg16[%c0_31, %c88] : memref<8x96xbf16, #tpu.memory_space<vmem>>, vector<8x8xbf16>
    %cst_32 = arith.constant dense<0.000000e+00> : vector<8x8xf32>
    %76 = tpu.matmul %73, %74, %cst_32 {dimension_numbers = #tpu.dot_dimension_numbers<[1], [1], [0], [0], [0, 0, 1, 0], [], []>} : vector<8x8xbf16>, vector<8x8xbf16>, vector<8x8xf32> -> vector<8x8xf32>
    %cst_33 = arith.constant dense<0xFF800000> : vector<8xf32>
    %77 = vector.multi_reduction <maximumf>, %76, %cst_33 [1] : vector<8x8xf32> to vector<8xf32>
    %78 = vector.shape_cast %77 : vector<8xf32> to vector<8x1xf32>
    %79 = vector.broadcast %78 : vector<8x1xf32> to vector<8x8xf32>
    %80 = arith.subf %76, %79 : vector<8x8xf32>
    %81 = math.exp %80 : vector<8x8xf32>
    %cst_34 = arith.constant dense<0.000000e+00> : vector<8xf32>
    %82 = vector.multi_reduction <add>, %81, %cst_34 [1] : vector<8x8xf32> to vector<8xf32>
    %83 = vector.shape_cast %82 : vector<8xf32> to vector<8x1xf32>
    %84 = tpu.reciprocal %83 {approx = true} : vector<8x1xf32> -> vector<8x1xf32>
    %85 = vector.broadcast %84 : vector<8x1xf32> to vector<8x8xf32>
    %86 = arith.mulf %81, %85 : vector<8x8xf32>
    %87 = arith.truncf %86 : vector<8x8xf32> to vector<8x8xbf16>
    %cst_35 = arith.constant dense<0.000000e+00> : vector<8x8xf32>
    %88 = tpu.matmul %87, %75, %cst_35 {dimension_numbers = #tpu.dot_dimension_numbers<[1], [0], [0], [1], [0, 0, 1, 1], [], []>} : vector<8x8xbf16>, vector<8x8xbf16>, vector<8x8xf32> -> vector<8x8xf32>
    %89 = arith.truncf %88 : vector<8x8xf32> to vector<8x8xbf16>
    %c24_36 = arith.constant 24 : index
    %c0_37 = arith.constant 0 : index
    %90 = vector.load %arg7[%c24_36, %c0_37] : memref<32x32xbf16, #tpu.memory_space<vmem>>, vector<8x32xbf16>
    %cst_38 = arith.constant dense<0.000000e+00> : vector<8x32xf32>
    %91 = tpu.matmul %89, %90, %cst_38 {dimension_numbers = #tpu.dot_dimension_numbers<[1], [0], [0], [1], [0, 0, 1, 1], [], []>} : vector<8x8xbf16>, vector<8x32xbf16>, vector<8x32xf32> -> vector<8x32xf32>
    %92 = arith.addf %71, %91 : vector<8x32xf32>
    %93 = arith.addf %7, %92 : vector<8x32xf32>
    %c0_39 = arith.constant 0 : index
    %c0_40 = arith.constant 0 : index
    %94 = vector.load %arg8[%c0_39, %c0_40] : memref<1x32xf32, #tpu.memory_space<vmem>>, vector<1x32xf32>
    %95 = vector.broadcast %94 : vector<1x32xf32> to vector<8x32xf32>
    %96 = arith.addf %93, %95 : vector<8x32xf32>
    %cst_41 = arith.constant dense<0.000000e+00> : vector<8xf32>
    %97 = vector.multi_reduction <add>, %96, %cst_41 [1] : vector<8x32xf32> to vector<8xf32>
    %98 = vector.shape_cast %97 : vector<8xf32> to vector<8x1xf32>
    %cst_42 = arith.constant 3.200000e+01 : f32
    %99 = vector.broadcast %cst_42 : f32 to vector<8x1xf32>
    %100 = arith.divf %98, %99 : vector<8x1xf32>
    %101 = vector.broadcast %100 : vector<8x1xf32> to vector<8x32xf32>
    %102 = arith.subf %96, %101 : vector<8x32xf32>
    %103 = arith.mulf %102, %102 : vector<8x32xf32>
    %cst_43 = arith.constant dense<0.000000e+00> : vector<8xf32>
    %104 = vector.multi_reduction <add>, %103, %cst_43 [1] : vector<8x32xf32> to vector<8xf32>
    %105 = vector.shape_cast %104 : vector<8xf32> to vector<8x1xf32>
    %cst_44 = arith.constant 3.200000e+01 : f32
    %106 = vector.broadcast %cst_44 : f32 to vector<8x1xf32>
    %107 = arith.divf %105, %106 : vector<8x1xf32>
    %108 = vector.broadcast %100 : vector<8x1xf32> to vector<8x32xf32>
    %109 = arith.subf %96, %108 : vector<8x32xf32>
    %cst_45 = arith.constant 9.99999997E-7 : f32
    %110 = vector.broadcast %cst_45 : f32 to vector<8x1xf32>
    %111 = arith.addf %107, %110 : vector<8x1xf32>
    %112 = math.rsqrt %111 : vector<8x1xf32>
    %113 = vector.broadcast %112 : vector<8x1xf32> to vector<8x32xf32>
    %114 = arith.mulf %109, %113 : vector<8x32xf32>
    %c0_46 = arith.constant 0 : index
    %c0_47 = arith.constant 0 : index
    %115 = vector.load %arg9[%c0_46, %c0_47] : memref<1x32xf32, #tpu.memory_space<vmem>>, vector<1x32xf32>
    %116 = vector.broadcast %115 : vector<1x32xf32> to vector<8x32xf32>
    %117 = arith.mulf %114, %116 : vector<8x32xf32>
    %c0_48 = arith.constant 0 : index
    %c0_49 = arith.constant 0 : index
    %118 = vector.load %arg10[%c0_48, %c0_49] : memref<1x32xf32, #tpu.memory_space<vmem>>, vector<1x32xf32>
    %119 = vector.broadcast %118 : vector<1x32xf32> to vector<8x32xf32>
    %120 = arith.addf %117, %119 : vector<8x32xf32>
    %121 = arith.truncf %120 : vector<8x32xf32> to vector<8x32xbf16>
    %c0_50 = arith.constant 0 : index
    %c0_51 = arith.constant 0 : index
    %122 = vector.load %arg11[%c0_50, %c0_51] : memref<32x64xbf16, #tpu.memory_space<vmem>>, vector<32x64xbf16>
    %cst_52 = arith.constant dense<0.000000e+00> : vector<8x64xf32>
    %123 = tpu.matmul %121, %122, %cst_52 {dimension_numbers = #tpu.dot_dimension_numbers<[1], [0], [0], [1], [0, 0, 1, 1], [], []>} : vector<8x32xbf16>, vector<32x64xbf16>, vector<8x64xf32> -> vector<8x64xf32>
    %c0_53 = arith.constant 0 : index
    %c0_54 = arith.constant 0 : index
    %124 = vector.load %arg12[%c0_53, %c0_54] : memref<1x64xf32, #tpu.memory_space<vmem>>, vector<1x64xf32>
    %125 = vector.broadcast %124 : vector<1x64xf32> to vector<8x64xf32>
    %126 = arith.addf %123, %125 : vector<8x64xf32>
    %cst_55 = arith.constant 5.000000e-01 : f32
    %127 = vector.broadcast %cst_55 : f32 to vector<8x64xf32>
    %128 = arith.mulf %127, %126 : vector<8x64xf32>
    %cst_56 = arith.constant 4.471500e-02 : f32
    %129 = vector.broadcast %cst_56 : f32 to vector<8x64xf32>
    %130 = arith.mulf %129, %126 : vector<8x64xf32>
    %131 = arith.mulf %130, %126 : vector<8x64xf32>
    %132 = arith.mulf %131, %126 : vector<8x64xf32>
    %133 = arith.addf %126, %132 : vector<8x64xf32>
    %cst_57 = arith.constant 0.797884583 : f32
    %134 = vector.broadcast %cst_57 : f32 to vector<8x64xf32>
    %135 = arith.mulf %134, %133 : vector<8x64xf32>
    %136 = math.tanh %135 : vector<8x64xf32>
    %cst_58 = arith.constant 1.000000e+00 : f32
    %137 = vector.broadcast %cst_58 : f32 to vector<8x64xf32>
    %138 = arith.addf %137, %136 : vector<8x64xf32>
    %139 = arith.mulf %128, %138 : vector<8x64xf32>
    %140 = arith.truncf %139 : vector<8x64xf32> to vector<8x64xbf16>
    %c0_59 = arith.constant 0 : index
    %c0_60 = arith.constant 0 : index
    %141 = vector.load %arg13[%c0_59, %c0_60] : memref<64x32xbf16, #tpu.memory_space<vmem>>, vector<64x32xbf16>
    %cst_61 = arith.constant dense<0.000000e+00> : vector<8x32xf32>
    %142 = tpu.matmul %140, %141, %cst_61 {dimension_numbers = #tpu.dot_dimension_numbers<[1], [0], [0], [1], [0, 0, 1, 1], [], []>} : vector<8x64xbf16>, vector<64x32xbf16>, vector<8x32xf32> -> vector<8x32xf32>
    %c0_62 = arith.constant 0 : index
    %c0_63 = arith.constant 0 : index
    %143 = vector.load %arg14[%c0_62, %c0_63] : memref<1x32xf32, #tpu.memory_space<vmem>>, vector<1x32xf32>
    %144 = vector.broadcast %143 : vector<1x32xf32> to vector<8x32xf32>
    %145 = arith.addf %142, %144 : vector<8x32xf32>
    %146 = arith.addf %96, %145 : vector<8x32xf32>
    %c0_64 = arith.constant 0 : index
    %c0_65 = arith.constant 0 : index
    %c0_66 = arith.constant 0 : index
    %147 = vector.load %arg15[%c0_64, %c0_65, %c0_66] : memref<1x8x32xf32, #tpu.memory_space<vmem>>, vector<1x8x32xf32>
    %148 = vector.shape_cast %147 : vector<1x8x32xf32> to vector<8x32xf32>
    %149 = vector.shape_cast %146 : vector<8x32xf32> to vector<1x8x32xf32>
    tpu.vector_store %arg15[%c0_64, %c0_65, %c0_66], %149 {strides = array<i32>} : memref<1x8x32xf32, #tpu.memory_space<vmem>>, vector<1x8x32xf32>,
    return
  }
  func.func @transform_0(%arg0: i32, %arg1: i32) -> (i32, i32, i32) {
    %c0_i32 = arith.constant 0 : i32
    %c0_i32_0 = arith.constant 0 : i32
    %c0_i32_1 = arith.constant 0 : i32
    return %arg0, %c0_i32, %c0_i32_0 : i32, i32, i32
  }
  func.func @transform_1(%arg0: i32, %arg1: i32) -> (i32, i32) {
    %c0_i32 = arith.constant 0 : i32
    %c0_i32_0 = arith.constant 0 : i32
    %c0_i32_1 = arith.constant 0 : i32
    return %c0_i32, %c0_i32_0 : i32, i32
  }
  func.func @transform_2(%arg0: i32, %arg1: i32) -> (i32, i32) {
    %c0_i32 = arith.constant 0 : i32
    %c0_i32_0 = arith.constant 0 : i32
    %c0_i32_1 = arith.constant 0 : i32
    return %c0_i32, %c0_i32_0 : i32, i32
  }
  func.func @transform_3(%arg0: i32, %arg1: i32) -> (i32, i32) {
    %c0_i32 = arith.constant 0 : i32
    %c0_i32_0 = arith.constant 0 : i32
    %c0_i32_1 = arith.constant 0 : i32
    return %c0_i32, %c0_i32_0 : i32, i32
  }
  func.func @transform_4(%arg0: i32, %arg1: i32) -> (i32, i32) {
    %c0_i32 = arith.constant 0 : i32
    %c0_i32_0 = arith.constant 0 : i32
    %c0_i32_1 = arith.constant 0 : i32
    return %c0_i32, %c0_i32_0 : i32, i32
  }
  func.func @transform_5(%arg0: i32, %arg1: i32) -> (i32, i32) {
    %c0_i32 = arith.constant 0 : i32
    %c0_i32_0 = arith.constant 0 : i32
    %c0_i32_1 = arith.constant 0 : i32
    return %c0_i32, %c0_i32_0 : i32, i32
  }
  func.func @transform_6(%arg0: i32, %arg1: i32) -> (i32, i32) {
    %c0_i32 = arith.constant 0 : i32
    %c0_i32_0 = arith.constant 0 : i32
    %c0_i32_1 = arith.constant 0 : i32
    return %c0_i32, %c0_i32_0 : i32, i32
  }
  func.func @transform_7(%arg0: i32, %arg1: i32) -> (i32, i32) {
    %c0_i32 = arith.constant 0 : i32
    %c0_i32_0 = arith.constant 0 : i32
    %c0_i32_1 = arith.constant 0 : i32
    return %c0_i32, %c0_i32_0 : i32, i32
  }
  func.func @transform_8(%arg0: i32, %arg1: i32) -> (i32, i32) {
    %c0_i32 = arith.constant 0 : i32
    %c0_i32_0 = arith.constant 0 : i32
    %c0_i32_1 = arith.constant 0 : i32
    return %c0_i32, %c0_i32_0 : i32, i32
  }
  func.func @transform_9(%arg0: i32, %arg1: i32) -> (i32, i32) {
    %c0_i32 = arith.constant 0 : i32
    %c0_i32_0 = arith.constant 0 : i32
    %c0_i32_1 = arith.constant 0 : i32
    return %c0_i32, %c0_i32_0 : i32, i32
  }
  func.func @transform_10(%arg0: i32, %arg1: i32) -> (i32, i32) {
    %c0_i32 = arith.constant 0 : i32
    %c0_i32_0 = arith.constant 0 : i32
    %c0_i32_1 = arith.constant 0 : i32
    return %c0_i32, %c0_i32_0 : i32, i32
  }
  func.func @transform_11(%arg0: i32, %arg1: i32) -> (i32, i32) {
    %c0_i32 = arith.constant 0 : i32
    %c0_i32_0 = arith.constant 0 : i32
    %c0_i32_1 = arith.constant 0 : i32
    return %c0_i32, %c0_i32_0 : i32, i32
  }
  func.func @transform_12(%arg0: i32, %arg1: i32) -> (i32, i32) {
    %c0_i32 = arith.constant 0 : i32
    %c0_i32_0 = arith.constant 0 : i32
    %c0_i32_1 = arith.constant 0 : i32
    return %c0_i32, %c0_i32_0 : i32, i32
  }
  func.func @transform_13(%arg0: i32, %arg1: i32) -> (i32, i32, i32) {
    %c0_i32 = arith.constant 0 : i32
    %c0_i32_0 = arith.constant 0 : i32
    return %arg0, %arg1, %c0_i32 : i32, i32, i32
  }
}

</mosaic_0001>

<bundles_post_ra>
// kernel: siglip_encoder.3
= control target key start
LH: loop header
LB: loop body
LE: loop exit
PB: predicated region body
PF: predicated region fallthrough
CT: control target
= control target key end

     0   :  { %s2366_s0 = inlined_call_operand.hbm [shape: f32[2,8,32], index: 0, kind: input, shape index: {}, may-alias: {0,13}]   ;;  %s2367_s1 = inlined_call_operand.vmem [shape: f32[1,32], index: 1, kind: input, shape index: {}]   ;;  %s2368_s2 = inlined_call_operand.vmem [shape: f32[1,32], index: 2, kind: input, shape index: {}]   ;;  %s2369_s3 = inlined_call_operand.vmem [shape: bf16[32,96], index: 3, kind: input, shape index: {}]   ;;  %s2370_s4 = inlined_call_operand.vmem [shape: f32[1,96], index: 4, kind: input, shape index: {}]   ;;  %s2371_s5 = inlined_call_operand.vmem [shape: bf16[32,32], index: 5, kind: input, shape index: {}]   ;;  %s2372_s6 = inlined_call_operand.vmem [shape: f32[1,32], index: 6, kind: input, shape index: {}]   ;;  %s2373_s7 = inlined_call_operand.vmem [shape: f32[1,32], index: 7, kind: input, shape index: {}]   ;;  %s2374_s8 = inlined_call_operand.vmem [shape: f32[1,32], index: 8, kind: input, shape index: {}]   ;;  %s2375_s9 = inlined_call_operand.vmem [shape: bf16[32,64], index: 9, kind: input, shape index: {}]   ;;  %s2376_s10 = inlined_call_operand.vmem [shape: f32[1,64], index: 10, kind: input, shape index: {}]   ;;  %s2377_s11 = inlined_call_operand.vmem [shape: bf16[64,32], index: 11, kind: input, shape index: {}]   ;;  %s2378_s12 = inlined_call_operand.vmem [shape: f32[1,32], index: 12, kind: input, shape index: {}]   ;;  %s2379_s13 = inlined_call_operand.hbm [shape: f32[2,8,32], index: 13, kind: output, shape index: {}, may-alias: {0,13}]  }
   0x1   :  { %2385 = sst [smem:[#allocation13_spill]] %s2379_s13 }
   0x2   :  { %18 = vsyncpa [#allocation4], 0 }
   0x3   :  { %20 = vsyncpa [#allocation4 + $0x1], 0 }
   0x4   :  { %21 = vsyncpa [#allocation5], 0 }
   0x5   :  { %23 = vsyncpa [#allocation5 + $0x1], 0  ;;  %s2013_s25 = smov 0   ;;  %s2015_s26 = smov 0  }
   0x6   :  { %s2017_s27 = smov 0   ;;  %s2019_s28 = smov 0  }
   0x7   :  { %s2021_s29 = smov 0   ;;  %s2023_s30 = smov 0  }
   0x8 LB: > { %2386 = sst [smem:[#allocation9_spill]] %s1906_s25  ;;  %s1526_s14 = sadd.s32 4294967295, %s1926_s30   ;;  %s1926_s30 = sphi %s2023_s30, %s29_s30   ;;  %s1922_s29 = sphi %s2021_s29, %s2404_s29   ;;  %s1918_s28 = sphi %s2019_s28, %s2403_s28   ;;  %s1914_s27 = sphi %s2017_s27, %s2407_s27   ;;  %s1910_s26 = sphi %s2015_s26, %s2406_s26   ;;  %s1906_s25 = sphi %s2013_s25, %s2405_s25  }
   0x9   : > { %2387 = sst [smem:[#allocation10_spill]] %s1922_s29  ;;  %s1527_s15 = sadd.s32 4294967294, %s1926_s30  }
   0xa   : > { %s41_s16 = sadd.s32 1, %s1922_s29  ;;  %s48_s17 = sadd.s32 1, %s1914_s27 }
   0xb   : > { %p43_p0 = scmp.ge.s32.totalorder %s41_s16, 2  ;;  %p55_p1 = scmp.ne.s32.totalorder %s1914_s27, %s1910_s26 }
   0xc   : > { %p56_p2 = scmp.eq.s32.totalorder %s1926_s30, 0  ;;  %p61_p3 = scmp.ne.s32.totalorder %s1910_s26, %s1906_s25 }
   0xd   : > { %s2409_s16 = smov (%p43_p0, %s41_s16), 0  ;;  %p62_p5 = scmp.eq.s32.totalorder %s1526_s14, 0 }
   0xe   : > { %2388 = sst [smem:[#allocation11_spill]] %s2409_s16  ;;  %p2054_p4 = por %p56_p2, %p55_p1 }
   0xf   : > { %s45_s19 = ssub.s32 %s1922_s29, %s2409_s16  ;;  %p339_p6 = scmp.eq.s32.totalorder %s1526_s14, 1 }
  0x10   : > { %p46_p7 = scmp.eq.s32.totalorder %s45_s19, 0  ;;  %p2060_p8 = por %p62_p5, %p61_p3 }
  0x11   : > { %p2064_p9 = por %p339_p6, %p55_p1  ;;  %p345_p10 = scmp.eq.s32.totalorder %s1527_s15, 1 }
  0x12   : > { %s2069_s22 = scalar_select %p46_p7, %s1914_s27, %s48_s17  }
  0x13   : > { %s2391_s21 = scalar_select %p2064_p9, 1, 0 }
  0x14   : > { %2392 = sst [smem:[#allocation12_spill]] %s2069_s22  ;;  %p2071_p11 = por %p345_p10, %p61_p3 }
  0x15   : > { %p1719_p13 = scmp.lt.s32.totalorder %s1926_s30, 2  ;;  %s401_s24 = sand.u32 1, %s1914_s27  }
  0x16   : > { %s2393_s23 = scalar_select %p2071_p11, 1, 0 }
  0x17   : > { %s1530_s14 = sshll.u32 %s401_s24, 3  ;;  %s1531_s19 = sshll.u32 %s1922_s29, 7 }
  0x18   : > { %s2082_s13 = scalar_lea.hbm %s2366_s0, %s1531_s19  ;;  %s405_s15 = scalar_lea.vmem [#allocation3], %s1530_s14 }
  0x19   : > { %s412_s17 = sshll.u32 %s405_s15, 4  ;;  %p2088_p0 = pnand %p1719_p13, %p2054_p4  ;;  %s2084_s17 = int_to_ptr.vmem [resolvable:$true] %s412_s17 }
  0x1a   : > { %s402_s25 = scalar_lea.sflag [#allocation4], %s401_s24  ;;  %s1814_s16 = scalar_lea.hbm %s2082_s13, 128 }
  0x1b   : > { %p1815_p3 = scmp.ne.s32.totalorder %s2082_s13, %s1814_s16  ;;  %p1816_p5 = pneg %p2088_p0 }
  0x1c   : > { %s1819_s18 = scalar_lea.hbm %s2366_s0, 256  ;;  %p1820_p4 = scmp.lt.u32.totalorder %s2082_s13, %s2366_s0 }
  0x1d   : > { %p1817_p6 = pnand %p1816_p5, %p1815_p3  ;;  %p1821_p10 = scmp.lt.u32.totalorder %s1819_s18, %s1814_s16 }
  0x1e   : > { %p1823_p12 = scmp.lt.u32.totalorder %s1814_s16, %s2082_s13 }
  0x1f   : > { %p1818_p7 = pneg %p1817_p6  ;;  %p1822_p13 = por %p1821_p10, %p1820_p4 }
  0x21   : > { %p1824_p1 = por %p1823_p12, %p1822_p13 }
  0x23   : > { %p1825_p2 = pnand %p1824_p1, %p1818_p7 }
  0x25   : > { %1828 = shalt.err (!%p1825_p2)
}
  0x26   : > { %s1829_s24 = scalar_lea.vmem %s2084_s17, 128  ;;  %s1928_s14 = smov [#allocation3]  }
  0x27   : > { %p1830_p3 = scmp.ne.s32.totalorder %s2084_s17, %s1829_s24  ;;  %s1834_s19 = sshll.u32 %s1928_s14, 4  ;;  %s1835_s19 = int_to_ptr.vmem [resolvable:$false] %s1834_s19 }
  0x28   : > { %s1836_s29 = scalar_lea.vmem %s1835_s19, 256  ;;  %p1837_p9 = scmp.lt.s32.totalorder %s2084_s17, %s1835_s19 }
  0x29   : > { %p1832_p6 = pnand %p1830_p3, %p1816_p5  ;;  %p1838_p4 = scmp.lt.s32.totalorder %s1836_s29, %s1829_s24 }
  0x2b   : > { %p1833_p11 = pneg %p1832_p6  ;;  %p1839_p10 = por %p1838_p4, %p1837_p9 }
  0x2d   : > { %p1840_p12 = pnand %p1839_p10, %p1833_p11 }
  0x2f   : > { %1843 = shalt.err (!%p1840_p12)
}
  0x30   : > { %1714 = dma.hbm_to_vmem [thread:$0]  (!%p2088_p0), %s2082_s13, 128, %s2084_s17, %s402_s25  }
  0x31   : > { %p2395_p1 = scmp.lt.s32.totalorder %s1926_s30, 3  ;;  %p2396_p2 = scmp.ge.s32.totalorder %s1926_s30, 1 }
  0x33   : > { %p418_p5 = pnand %p2396_p2, %p2395_p1 }
  0x34   : > { %s2124_s16 = sand.u32 (!%p418_p5), 1, %s1910_s26  }
  0x35   : > { %421 = sbr.rel (%p418_p5) target bundleno = 3765 (0xeb5), region = 72  ;;  %s1533_s18 = sshll.u32 (!%p418_p5), %s2124_s16, 3 }
  0x36   : > { %s424_s15 = scalar_lea.sflag (!%p418_p5), [#allocation4], %s2124_s16  ;;  %s427_s22 = scalar_lea.vmem (!%p418_p5), [#allocation3], %s1533_s18 }
  0x3c   : > { %1897 = dma.done.wait (%p2060_p8), %s424_s15, 128  }
  0x3d   : > { %1899 = vsyncadd (%p2060_p8), %s424_s15, 4294967168  ;;  %vm476_vm0 = vcmask 261120   ;;  %v2134_v0 = vld [vmem:[%s427_s22] sm:$0xff]  ;;  %v1929_v8 = vmov 0.0   ;;  %vm1930_vm1 = vmmov 0   ;;  %vm575_vm2 = vcmask 781312  }
  0x3e   : > { %v477_v1 = vsel %vm476_vm0, %v2134_v0, 0.0  ;;  %v1782_v7 = vld [vmem:[%s2369_s3] sm:$0xff]   ;;  %1607 = vmatprep.subr.bf16.mxu1 %v1929_v8  ;;  %1611 = vmatprep.mubr.msk.bf16.mxu1 %vm1930_vm1, %v1929_v8  ;;  %v1783_v9 = vld [vmem:[%s2369_s3 + $0x8] sm:$0xff]   ;;  %s1931_s13 = smov 96   ;;  %s1932_s17 = smov 120   ;;  %vm591_vm3 = vcmask 64512  }
  0x3f   : > { %478 = vadd.xlane.f32.xlu0 %v477_v1  ;;  %1608 = vmatpush3.bf16.msra.mxu1 %v1782_v7  ;;  %v1535_v14 = vld [vmem:[%s2367_s1] ss:$0 sm:$0xff]  ;;  %s1933_s20 = smov 88   ;;  %s1934_s25 = smov 56   ;;  %vm655_vm4 = vcmask 1043456   ;;  %vm1382_vm5 = vcmask 523264  }
  0x40   : > { %1621 = vmatprep.subr.bf16.mxu0 %v1929_v8  ;;  %1609 = vmatprep.subr.bf16.mxu1 %v1929_v8  ;;  %v1536_v16 = vld [vmem:[%s2368_s2] ss:$0 sm:$0xff]  ;;  %s1935_s24 = smov 64   ;;  %s1936_s14 = smov 80  }
  0x41   : > { %1623 = vmatprep.mubr.msk.bf16.mxu0 %vm1930_vm1, %v1929_v8  ;;  %v1537_v20 = vld [vmem:[%s2370_s4] ss:$0 sm:$0xff]  ;;  %s1937_s19 = smov 112   ;;  %p2398_p9 = scmp.ne.s32.totalorder %s2391_s21, 0 }
  0x42   : > { %s1942_s15 = smov [#allocation6]  }
  0x43   : > { %1610 = vmatpush3.bf16.msra.mxu1 %v1783_v9  ;;  %s1848_s22 = sshll.u32 %s1942_s15, 4  ;;  %s1849_s22 = int_to_ptr.vmem [resolvable:$false] %s1848_s22 }
  0x44   : > { %1615 = vmatprep.subr.bf16.mxu1 %v1929_v8 }
  0xcc   : > { %v479_v2 = vpop.xlane.xlu0 %478 }
  0xcd   : > { %v481_v3 = vmul.f32 0.03125, %v479_v2 }
  0xcf   : > { %v482_v4 = vsub.f32 %v2134_v0, %v481_v3 }
  0xd1   : > { %v483_v5 = vmul.f32 %v482_v4, %v482_v4 }
  0xd3   : > { %v484_v6 = vsel %vm476_vm0, %v483_v5, 0.0 }
  0xd4   : > { %485 = vadd.xlane.f32.xlu0 %v484_v6  ;;  %v815_v6 = vld [vmem:[%s2371_s5 + $0x4] sm:$0xf] }
  0xd5   : > { %v820_v7 = vsel %vm655_vm4, %v815_v6, 0 }
 0x161   : > { %v486_v10 = vpop.xlane.xlu0 %485 }
 0x162   : > { %v487_v11 = vmul.f32 0.03125, %v486_v10 }
 0x164   : > { %v488_v12 = vadd.f32 1e-06, %v487_v11 }
 0x166   : > { %1792 = vrsqrt.f32 %v488_v12 }
 0x170   : > { %v1793_v13 = vpop.eup %1792 }
 0x171   : > { %v490_v15 = vmul.f32 %v1793_v13, %v482_v4  ;;  %v700_v4 = vld [vmem:[%s2371_s5] sm:$0xf] }
 0x172   : > { %v866_v5 = vsel %vm655_vm4, %v700_v4, 0 }
 0x173   : > { %v498_v17 = vmul.f32 %v1535_v14, %v490_v15 }
 0x175   : > { %v506_v18 = vadd.f32 %v1536_v16, %v498_v17 }
 0x177   : > { %v507_v19 = vpack.c.bf16 %v506_v18, %v506_v18 }
 0x179   : > { %1612 = vmatmul.mubr.msk.bf16.vlgmr.msra.gmra.mrb[0].mxu1 %vm476_vm0, %v507_v19 }
 0x17a   : > { %1617 = vmatprep.mubr.msk.bf16.mxu1 %vm1930_vm1, %v1929_v8 }
 0x24c   : > { %v568_v21 = vpop.f32.mrb[0].mxu1 }
 0x24d   : > { %v569_v22 = vadd.f32 %v1537_v20, %v568_v21  ;;  %v1613_v23 = vpop.f32.mrb[1].mxu1 }
 0x24e   : > { %v571_v24 = vpop.f32.mrb[2].mxu1 }
 0x24f   : > { %v574_v25 = vpack.c.bf16 %v569_v22, %v569_v22  ;;  %v1614_v26 = vpop.f32.mrb[3].mxu1 }
 0x251   : > { %576 = vst.msk [vmem:[#allocation2] sm:$0xf] %vm575_vm2, %v574_v25 }
 0x258   : > { %v2166_v27 = vld [vmem:[#allocation2] ss:$0 sps:$4 sm:$0xff]  }
 0x259   : > { %v584_v28 = vld [vmem:[#allocation2] sm:$0xf]  ;;  %589 = vrot.lane.b32.xlu1 %v2166_v27, %s1931_s13  ;;  %s1850_s13 = scalar_lea.vmem %s1849_s22, 256 }
 0x25a   : > { %v2168_v29 = vcombine.low %v584_v28, %v584_v28 }
 0x25c   : > { %704 = vrot.lane.b32.xlu0 %v2168_v29, %s1932_s17  ;;  %s1938_s17 = smov 48  }
 0x25d   : > { %706 = vrot.lane.b32.xlu1 %v2166_v27, %s1933_s20  ;;  %s1939_s20 = smov 104  }
 0x2cb   : > { %v590_v30 = vpop.permute.xlu1 %589 }
 0x2cc   : > { %v596_v31 = vsel %vm591_vm3, %v590_v30, 0 }
 0x2cd   : > { %1616 = vmatpush3.bf16.xpose.msra.mxu1 %v596_v31 }
 0x2ce   : > { %1627 = vmatprep.subr.bf16.mxu1 %v1929_v8  ;;  %v705_v34 = vpop.permute.xlu0 %704 }
 0x2cf   : > { %v707_v32 = vpop.permute.xlu1 %706 }
 0x2d0   : > { %v712_v33 = vsel %vm591_vm3, %v707_v32, 0 }
 0x2d4   : > { %1618 = vmatmul.mubr.msk.bf16.vlgmr.msra.gmra.mrb[4].mxu1 %vm591_vm3, %v584_v28 }
 0x2d5   : > { %1628 = vmatpush3.bf16.xpose.msra.mxu1 %v712_v33  ;;  %1629 = vmatprep.mubr.msk.bf16.mxu1 %vm1930_vm1, %v1929_v8 }
 0x2d6   : > { %1639 = vmatprep.subr.bf16.mxu1 %v1929_v8 }
 0x2dc   : > { %1630 = vmatmul.mubr.msk.bf16.vlgmr.msra.gmra.mrb[8].mxu1 %vm591_vm3, %v705_v34 }
 0x2dd   : > { %1641 = vmatprep.mubr.msk.bf16.mxu1 %vm1930_vm1, %v1929_v8  ;;  %1640 = vmatpush3.bf16.msra.mxu1 %v820_v7 }
 0x2de   : > { %1651 = vmatprep.subr.bf16.mxu1 %v1929_v8 }
 0x3a7   : > { %v632_v35 = vpop.f32.mrb[4].mxu1 }
 0x3a8   : > { %v1619_v36 = vpop.f32.mrb[5].mxu1  ;;  %v638_v37 = vsel %vm591_vm3, %v632_v35, -inf }
 0x3a9   : > { %639 = vmax.xlane.f32.xlu1 %v638_v37  ;;  %v635_v38 = vpop.f32.mrb[6].mxu1 }
 0x3aa   : > { %v1620_v39 = vpop.f32.mrb[7].mxu1 }
 0x3af   : > { %v748_v40 = vpop.f32.mrb[8].mxu1 }
 0x3b0   : > { %v1631_v41 = vpop.f32.mrb[9].mxu1  ;;  %v754_v42 = vsel %vm591_vm3, %v748_v40, -inf }
 0x3b1   : > { %755 = vmax.xlane.f32.xlu0 %v754_v42  ;;  %v751_v43 = vpop.f32.mrb[10].mxu1 }
 0x3b2   : > { %v1632_v44 = vpop.f32.mrb[11].mxu1 }
 0x3c7   : > { %766 = vrot.lane.b32.xlu0 %v2166_v27, %s1934_s25  ;;  %s1940_s25 = smov 72  }
 0x436   : > { %v640_v45 = vpop.xlane.xlu1 %639 }
 0x437   : > { %v641_v46 = vsub.f32 %v632_v35, %v640_v45 }
 0x439   : > { %v642_v47 = vmul.f32 1.442695, %v641_v46 }
 0x43b   : > { %1794 = vpow2.f32 %v642_v47 }
 0x43e   : > { %v756_v48 = vpop.xlane.xlu0 %755 }
 0x43f   : > { %v757_v49 = vsub.f32 %v748_v40, %v756_v48 }
 0x441   : > { %v758_v50 = vmul.f32 1.442695, %v757_v49 }
 0x442   : > { %v767_v61 = vpop.permute.xlu0 %766 }
 0x443   : > { %1796 = vpow2.f32 %v758_v50  ;;  %v772_v63 = vsel %vm655_vm4, %v767_v61, 0 }
 0x445   : > { %v1795_v51 = vpop.eup %1794 }
 0x446   : > { %v644_v52 = vsel %vm591_vm3, %v1795_v51, 0.0 }
 0x447   : > { %645 = vadd.xlane.f32.xlu1 %v644_v52 }
 0x44d   : > { %v1797_v53 = vpop.eup %1796 }
 0x44e   : > { %v760_v54 = vsel %vm591_vm3, %v1797_v53, 0.0 }
 0x44f   : > { %761 = vadd.xlane.f32.xlu1 %v760_v54 }
 0x460   : > { %650 = vrot.lane.b32.xlu1 %v2166_v27, %s1935_s24 }
 0x464   : > { %910 = vrot.lane.b32.xlu1 %v2166_v27, %s1936_s14 }
 0x468   : > { %908 = vrot.lane.b32.xlu1 %v2168_v29, %s1937_s19  ;;  %s1941_s19 = smov 40  }
 0x4d4   : > { %v646_v55 = vpop.xlane.xlu1 %645 }
 0x4d5   : > { %1798 = vrcp.f32 %v646_v55 }
 0x4dc   : > { %v762_v56 = vpop.xlane.xlu1 %761 }
 0x4dd   : > { %1800 = vrcp.f32 %v762_v56 }
 0x4df   : > { %v1799_v57 = vpop.eup %1798 }
 0x4e0   : > { %v651_v58 = vpop.permute.xlu1 %650  ;;  %v648_v59 = vmul.f32 %v1799_v57, %v1795_v51  ;;  %v1019_v51 = vld [vmem:[%s2371_s5 + $0x8] sm:$0xf] }
 0x4e1   : > { %v657_v60 = vsel %vm655_vm4, %v651_v58, 0  ;;  %v1024_v52 = vsel %vm655_vm4, %v1019_v51, 0  ;;  %v1790_v51 = vld [vmem:[%s2377_s11 + $0x10] sm:$0xff]  }
 0x4e2   : > { %1622 = vmatpush3.bf16.msra.mxu0 %v657_v60  ;;  %v649_v62 = vpack.c.bf16 %v648_v59, %v648_v59 }
 0x4e3   : > { %1633 = vmatprep.subr.bf16.mxu0 %v1929_v8 }
 0x4e4   : > { %v911_v14 = vpop.permute.xlu1 %910 }
 0x4e5   : > { %1624 = vmatmul.mubr.msk.bf16.vlgmr.msra.gmra.mrb[0].mxu0 %vm591_vm3, %v649_v62  ;;  %v916_v19 = vsel %vm591_vm3, %v911_v14, 0 }
 0x4e6   : > { %1634 = vmatpush3.bf16.msra.mxu0 %v772_v63  ;;  %1635 = vmatprep.mubr.msk.bf16.mxu0 %vm1930_vm1, %v1929_v8 }
 0x4e7   : > { %v1801_v1 = vpop.eup %1800  ;;  %1645 = vmatprep.subr.bf16.mxu0 %v1929_v8 }
 0x4e8   : > { %v764_v2 = vmul.f32 %v1801_v1, %v1797_v53  ;;  %v909_v21 = vpop.permute.xlu1 %908 }
 0x4ea   : > { %v765_v3 = vpack.c.bf16 %v764_v2, %v764_v2 }
 0x4ed   : > { %1636 = vmatmul.mubr.msk.bf16.vlgmr.msra.gmra.mrb[4].mxu0 %vm591_vm3, %v765_v3 }
 0x4ee   : > { %1647 = vmatprep.mubr.msk.bf16.mxu0 %vm1930_vm1, %v1929_v8  ;;  %1646 = vmatpush3.bf16.msra.mxu0 %v866_v5  ;;  %v1178_v5 = vld [vmem:[%s2371_s5 + $0xc] sm:$0xf] }
 0x4ef   : > { %1657 = vmatprep.subr.bf16.mxu0 %v1929_v8  ;;  %v1183_v6 = vsel %vm655_vm4, %v1178_v5, 0  ;;  %v1562_v5 = vld [vmem:[%s2378_s12] ss:$0 sm:$0xff] }
 0x5b8   : > { %v693_v9 = vpop.f32.mrb[0].mxu0 }
 0x5b9   : > { %v699_v10 = vpack.c.bf16 %v693_v9, %v693_v9  ;;  %v1625_v11 = vpop.f32.mrb[1].mxu0 }
 0x5ba   : > { %v696_v12 = vpop.f32.mrb[2].mxu0 }
 0x5bb   : > { %v1626_v13 = vpop.f32.mrb[3].mxu0  ;;  %1648 = vmatmul.mubr.msk.bf16.vlgmr.msra.gmra.mrb[8].mxu0 %vm591_vm3, %v699_v10 }
 0x5bc   : > { %1659 = vmatprep.mubr.msk.bf16.mxu0 %vm1930_vm1, %v1929_v8 }
 0x5c0   : > { %v808_v15 = vpop.f32.mrb[4].mxu0 }
 0x5c1   : > { %v814_v16 = vpack.c.bf16 %v808_v15, %v808_v15  ;;  %v1637_v17 = vpop.f32.mrb[5].mxu0 }
 0x5c2   : > { %v811_v18 = vpop.f32.mrb[6].mxu0 }
 0x5c3   : > { %v1638_v20 = vpop.f32.mrb[7].mxu0  ;;  %1642 = vmatmul.mubr.msk.bf16.vlgmr.msra.gmra.mrb[12].mxu1 %vm591_vm3, %v814_v16 }
 0x5c4   : > { %1652 = vmatpush3.bf16.xpose.msra.mxu1 %v916_v19  ;;  %1653 = vmatprep.mubr.msk.bf16.mxu1 %vm1930_vm1, %v1929_v8 }
 0x5c5   : > { %1663 = vmatprep.subr.bf16.mxu1 %v1929_v8 }
 0x5cb   : > { %1654 = vmatmul.mubr.msk.bf16.vlgmr.msra.gmra.mrb[16].mxu1 %vm591_vm3, %v909_v21 }
 0x5cc   : > { %1665 = vmatprep.mubr.msk.bf16.mxu1 %vm1930_vm1, %v1929_v8  ;;  %1664 = vmatpush3.bf16.msra.mxu1 %v1024_v52  ;;  %v1791_v52 = vld [vmem:[%s2377_s11 + $0x18] sm:$0xff]  }
 0x5cd   : > { %1675 = vmatprep.subr.bf16.mxu1 %v1929_v8 }
 0x68e   : > { %v902_v22 = vpop.f32.mrb[8].mxu0 }
 0x68f   : > { %v1649_v23 = vpop.f32.mrb[9].mxu0 }
 0x690   : > { %v905_v24 = vpop.f32.mrb[10].mxu0 }
 0x691   : > { %v1650_v25 = vpop.f32.mrb[11].mxu0 }
 0x696   : > { %v856_v26 = vpop.f32.mrb[12].mxu1 }
 0x697   : > { %v2222_v28 = vadd.f32 %v902_v22, %v856_v26  ;;  %v1643_v30 = vpop.f32.mrb[13].mxu1  ;;  %v1555_v26 = vld [vmem:[%s2372_s6] ss:$0 sm:$0xff] }
 0x698   : > { %v859_v31 = vpop.f32.mrb[14].mxu1 }
 0x699   : > { %v1644_v32 = vpop.f32.mrb[15].mxu1 }
 0x69e   : > { %v952_v33 = vpop.f32.mrb[16].mxu1 }
 0x69f   : > { %v1655_v34 = vpop.f32.mrb[17].mxu1  ;;  %v958_v35 = vsel %vm591_vm3, %v952_v33, -inf }
 0x6a0   : > { %959 = vmax.xlane.f32.xlu1 %v958_v35  ;;  %v955_v36 = vpop.f32.mrb[18].mxu1 }
 0x6a1   : > { %v1656_v37 = vpop.f32.mrb[19].mxu1 }
 0x6b1   : > { %970 = vrot.lane.b32.xlu1 %v2166_v27, %s1938_s17  ;;  %s1569_s17 = sshll.u32 %s1918_s28, 7  ;;  %s1429_s28 = scalar_lea.sflag [#allocation5], %s2124_s16 }
 0x6b5   : > { %1067 = vrot.lane.b32.xlu1 %v2168_v29, %s1939_s20  ;;  %s469_s20 = scalar_lea.vmem [#allocation6], %s1533_s18 }
 0x72d   : > { %v960_v38 = vpop.xlane.xlu1 %959 }
 0x72e   : > { %v961_v39 = vsub.f32 %v952_v33, %v960_v38 }
 0x730   : > { %v962_v40 = vmul.f32 1.442695, %v961_v39  ;;  %v1786_v39 = vld [vmem:[%s2375_s9] sm:$0xff]  }
 0x731   : > { %v971_v41 = vpop.permute.xlu1 %970 }
 0x732   : > { %1802 = vpow2.f32 %v962_v40  ;;  %v976_v42 = vsel %vm655_vm4, %v971_v41, 0 }
 0x733   : > { %1658 = vmatpush3.bf16.msra.mxu0 %v976_v42 }
 0x734   : > { %1669 = vmatprep.subr.bf16.mxu0 %v1929_v8 }
 0x735   : > { %v1068_v50 = vpop.permute.xlu1 %1067 }
 0x73c   : > { %v1803_v43 = vpop.eup %1802 }
 0x73d   : > { %v964_v44 = vsel %vm591_vm3, %v1803_v43, 0.0 }
 0x73e   : > { %965 = vadd.xlane.f32.xlu0 %v964_v44  ;;  %v1556_v44 = vld [vmem:[%s2373_s7] ss:$0 sm:$0xff] }
 0x754   : > { %1069 = vrot.lane.b32.xlu0 %v2166_v27, %s1940_s25  ;;  %s1443_s25 = sshll.u32 %s469_s20, 4  ;;  %s2318_s25 = int_to_ptr.vmem [resolvable:$true] %s1443_s25 }
 0x755   : > { %s1844_s18 = scalar_lea.vmem %s2318_s25, 128  ;;  %p1851_p7 = scmp.lt.s32.totalorder %s2318_s25, %s1849_s22 }
 0x756   : > { %p1845_p8 = scmp.ne.s32.totalorder %s2318_s25, %s1844_s18  ;;  %p1852_p13 = scmp.lt.s32.totalorder %s1850_s13, %s1844_s18 }
 0x758   : > { %p1846_p11 = pnand %p1845_p8, %p2398_p9  ;;  %p1853_p3 = por %p1852_p13, %p1851_p7 }
 0x75a   : > { %p1847_p0 = pneg %p1846_p11 }
 0x75c   : > { %p1854_p6 = pnand %p1853_p3, %p1847_p0 }
 0x7cb   : > { %v966_v45 = vpop.xlane.xlu0 %965 }
 0x7cc   : > { %1804 = vrcp.f32 %v966_v45 }
 0x7cf   : > { %v1070_v47 = vpop.permute.xlu0 %1069 }
 0x7d0   : > { %v1075_v49 = vsel %vm591_vm3, %v1070_v47, 0 }
 0x7d6   : > { %v1805_v29 = vpop.eup %1804 }
 0x7d7   : > { %v968_v46 = vmul.f32 %v1805_v29, %v1803_v43  ;;  %v1557_v29 = vld [vmem:[%s2374_s8] ss:$0 sm:$0xff] }
 0x7d9   : > { %v969_v48 = vpack.c.bf16 %v968_v46, %v968_v46 }
 0x7db   : > { %1660 = vmatmul.mubr.msk.bf16.vlgmr.msra.gmra.mrb[12].mxu0 %vm591_vm3, %v969_v48 }
 0x7dc   : > { %1670 = vmatpush3.bf16.xpose.msra.mxu0 %v1075_v49  ;;  %1671 = vmatprep.mubr.msk.bf16.mxu0 %vm1930_vm1, %v1929_v8  ;;  %v1788_v49 = vld [vmem:[%s2377_s11] sm:$0xff]  }
 0x7dd   : > { %1681 = vmatprep.subr.bf16.mxu0 %v1929_v8 }
 0x7e3   : > { %1672 = vmatmul.mubr.msk.bf16.vlgmr.msra.gmra.mrb[16].mxu0 %vm591_vm3, %v1068_v50  ;;  %v1789_v50 = vld [vmem:[%s2377_s11 + $0x8] sm:$0xff]  }
 0x7e4   : > { %1683 = vmatprep.mubr.msk.bf16.mxu0 %vm1930_vm1, %v1929_v8  ;;  %1682 = vmatpush3.bf16.msra.mxu0 %v1183_v6 }
 0x7e5   : > { %1695 = vmatprep.subr.bf16.mxu0 %v1929_v8 }
 0x8ae   : > { %v1012_v53 = vpop.f32.mrb[12].mxu0 }
 0x8af   : > { %v1018_v54 = vpack.c.bf16 %v1012_v53, %v1012_v53  ;;  %v1661_v55 = vpop.f32.mrb[13].mxu0  ;;  %v1558_v53 = vld [vmem:[%s2376_s10] ss:$0 sm:$0xff] }
 0x8b0   : > { %v1015_v56 = vpop.f32.mrb[14].mxu0 }
 0x8b1   : > { %v1662_v57 = vpop.f32.mrb[15].mxu0  ;;  %1666 = vmatmul.mubr.msk.bf16.vlgmr.msra.gmra.mrb[20].mxu1 %vm591_vm3, %v1018_v54 }
 0x8b2   : > { %1677 = vmatprep.mubr.msk.bf16.mxu1 %vm1930_vm1, %v1929_v8 }
 0x8b6   : > { %v1111_v58 = vpop.f32.mrb[16].mxu0 }
 0x8b7   : > { %v1673_v59 = vpop.f32.mrb[17].mxu0  ;;  %v1117_v60 = vsel %vm591_vm3, %v1111_v58, -inf }
 0x8b8   : > { %1118 = vmax.xlane.f32.xlu1 %v1117_v60  ;;  %v1114_v61 = vpop.f32.mrb[18].mxu0 }
 0x8b9   : > { %v1674_v62 = vpop.f32.mrb[19].mxu0 }
 0x945   : > { %v1119_v63 = vpop.xlane.xlu1 %1118 }
 0x946   : > { %v1120_v1 = vsub.f32 %v1111_v58, %v1119_v63 }
 0x948   : > { %v1121_v2 = vmul.f32 1.442695, %v1120_v1 }
 0x94a   : > { %1806 = vpow2.f32 %v1121_v2 }
 0x954   : > { %v1807_v3 = vpop.eup %1806 }
 0x955   : > { %v1123_v4 = vsel %vm591_vm3, %v1807_v3, 0.0 }
 0x956   : > { %1124 = vadd.xlane.f32.xlu0 %v1123_v4 }
 0x96c   : > { %1129 = vrot.lane.b32.xlu0 %v2166_v27, %s1941_s19  ;;  %s2397_s19 = sld [smem:[#allocation13_spill]] }
 0x972   : > { %s2316_s29 = scalar_lea.hbm %s2397_s19, %s1569_s17 }
 0x984   : > { %v1060_v7 = vpop.f32.mrb[20].mxu1 }
 0x985   : > { %v1066_v9 = vadd.f32 %v1060_v7, %v2222_v28  ;;  %v1667_v10 = vpop.f32.mrb[21].mxu1 }
 0x986   : > { %v1063_v11 = vpop.f32.mrb[22].mxu1 }
 0x987   : > { %v1668_v12 = vpop.f32.mrb[23].mxu1 }
 0x9e3   : > { %v1125_v13 = vpop.xlane.xlu0 %1124 }
 0x9e4   : > { %1808 = vrcp.f32 %v1125_v13 }
 0x9e7   : > { %v1130_v14 = vpop.permute.xlu0 %1129 }
 0x9e8   : > { %v1135_v27 = vsel %vm655_vm4, %v1130_v14, 0 }
 0x9e9   : > { %1676 = vmatpush3.bf16.msra.mxu1 %v1135_v27 }
 0x9ea   : > { %1687 = vmatprep.subr.bf16.mxu1 %v1929_v8 }
 0x9ee   : > { %v1809_v15 = vpop.eup %1808 }
 0x9ef   : > { %v1127_v16 = vmul.f32 %v1809_v15, %v1807_v3 }
 0x9f1   : > { %v1128_v17 = vpack.c.bf16 %v1127_v16, %v1127_v16 }
 0x9f3   : > { %1678 = vmatmul.mubr.msk.bf16.vlgmr.msra.gmra.mrb[24].mxu1 %vm591_vm3, %v1128_v17 }
 0x9f4   : > { %1691 = vmatprep.mubr.msk.bf16.mxu1 %vm1930_vm1, %v1929_v8  ;;  %1688 = vmatpush3.bf16.msra.mxu1 %v1786_v39 }
 0x9f5   : > { %1689 = vmatprep.subr.bf16.mxu1 %v1929_v8 }
 0xac6   : > { %v1171_v18 = vpop.f32.mrb[24].mxu1 }
 0xac7   : > { %v1177_v19 = vpack.c.bf16 %v1171_v18, %v1171_v18  ;;  %v1679_v20 = vpop.f32.mrb[25].mxu1 }
 0xac8   : > { %v1174_v21 = vpop.f32.mrb[26].mxu1 }
 0xac9   : > { %v1680_v22 = vpop.f32.mrb[27].mxu1  ;;  %1684 = vmatmul.mubr.msk.bf16.vlgmr.msra.gmra.mrb[20].mxu0 %vm591_vm3, %v1177_v19 }
 0xaca   : > { %1703 = vmatprep.mubr.msk.bf16.mxu0 %vm1930_vm1, %v1929_v8  ;;  %1696 = vmatpush3.bf16.msra.mxu0 %v1788_v49 }
 0xacb   : > { %1697 = vmatprep.subr.bf16.mxu0 %v1929_v8 }
 0xace   : > { %1698 = vmatpush3.bf16.msra.mxu0 %v1789_v50 }
 0xacf   : > { %1699 = vmatprep.subr.bf16.mxu0 %v1929_v8 }
 0xad2   : > { %1700 = vmatpush3.bf16.msra.mxu0 %v1790_v51 }
 0xad3   : > { %1701 = vmatprep.subr.bf16.mxu0 %v1929_v8 }
 0xad6   : > { %1702 = vmatpush3.bf16.msra.mxu0 %v1791_v52 }
 0xb9c   : > { %v1219_v23 = vpop.f32.mrb[20].mxu0 }
 0xb9d   : > { %v1225_v24 = vadd.f32 %v1219_v23, %v1066_v9  ;;  %v1685_v25 = vpop.f32.mrb[21].mxu0 }
 0xb9e   : > { %v1222_v28 = vpop.f32.mrb[22].mxu0 }
 0xb9f   : > { %v1226_v30 = vadd.f32 %v1225_v24, %v2134_v0  ;;  %v1686_v31 = vpop.f32.mrb[23].mxu0  ;;  %v1787_v0 = vld [vmem:[%s2375_s9 + $0x8] sm:$0xff]  }
 0xba0   : > { %1690 = vmatpush3.bf16.msra.mxu1 %v1787_v0 }
 0xba1   : > { %v2268_v32 = vadd.f32 %v1555_v26, %v1226_v30 }
 0xba3   : > { %v1236_v33 = vsel %vm476_vm0, %v2268_v32, 0.0 }
 0xba4   : > { %1237 = vadd.xlane.f32.xlu1 %v1236_v33 }
 0xc31   : > { %v1238_v34 = vpop.xlane.xlu1 %1237 }
 0xc32   : > { %v1240_v35 = vmul.f32 0.03125, %v1238_v34 }
 0xc34   : > { %v1241_v36 = vsub.f32 %v2268_v32, %v1240_v35 }
 0xc36   : > { %v1242_v37 = vmul.f32 %v1241_v36, %v1241_v36 }
 0xc38   : > { %v1243_v38 = vsel %vm476_vm0, %v1242_v37, 0.0 }
 0xc39   : > { %1244 = vadd.xlane.f32.xlu1 %v1243_v38 }
 0xcc6   : > { %v1245_v40 = vpop.xlane.xlu1 %1244 }
 0xcc7   : > { %v1246_v41 = vmul.f32 0.03125, %v1245_v40 }
 0xcc9   : > { %v1247_v42 = vadd.f32 1e-06, %v1246_v41 }
 0xccb   : > { %1810 = vrsqrt.f32 %v1247_v42 }
 0xcd5   : > { %v1811_v43 = vpop.eup %1810 }
 0xcd6   : > { %v1249_v45 = vmul.f32 %v1811_v43, %v1241_v36 }
 0xcd8   : > { %v1257_v46 = vmul.f32 %v1556_v44, %v1249_v45 }
 0xcda   : > { %v1265_v47 = vadd.f32 %v1557_v29, %v1257_v46 }
 0xcdc   : > { %v1266_v48 = vpack.c.bf16 %v1265_v47, %v1265_v47 }
 0xcde   : > { %1692 = vmatmul.mubr.msk.bf16.vlgmr.msra.gmra.mrb[28].mxu1 %vm476_vm0, %v1266_v48 }
 0xdb1   : > { %v1327_v54 = vpop.f32.mrb[28].mxu1 }
 0xdb2   : > { %v1328_v55 = vadd.f32 %v1558_v53, %v1327_v54  ;;  %v1693_v56 = vpop.f32.mrb[29].mxu1 }
 0xdb3   : > { %v1330_v57 = vpop.f32.mrb[30].mxu1 }
 0xdb4   : > { %v1334_v58 = vmul.f32 0.044715, %v1328_v55  ;;  %v1694_v59 = vpop.f32.mrb[31].mxu1  ;;  %v1333_v8 = vmul.f32 0.5, %v1328_v55 }
 0xdb6   : > { %v1335_v60 = vmul.f32 %v1334_v58, %v1328_v55 }
 0xdb8   : > { %v1336_v61 = vmul.f32 %v1335_v60, %v1328_v55 }
 0xdba   : > { %v1337_v62 = vadd.f32 %v1336_v61, %v1328_v55 }
 0xdbc   : > { %v1338_v63 = vmul.f32 0.7978846, %v1337_v62 }
 0xdbe   : > { %1812 = vtanh.f32 %v1338_v63 }
 0xdc8   : > { %v1813_v1 = vpop.eup %1812 }
 0xdc9   : > { %v1340_v2 = vadd.f32 1.0, %v1813_v1 }
 0xdcb   : > { %v1341_v3 = vmul.f32 %v1340_v2, %v1333_v8 }
 0xdcd   : > { %v1342_v4 = vpack.c.bf16 %v1341_v3, %v1341_v3 }
 0xdcf   : > { %1704 = vmatmul.mubr.msk.bf16.vlgmr.msra.gmra.mrb[24].mxu0 %vm1382_vm5, %v1342_v4 }
 0xea2   : > { %v1420_v6 = vpop.f32.mrb[24].mxu0 }
 0xea3   : > { %v1421_v7 = vadd.f32 %v1562_v5, %v1420_v6  ;;  %v1705_v9 = vpop.f32.mrb[25].mxu0 }
 0xea4   : > { %v1423_v10 = vpop.f32.mrb[26].mxu0 }
 0xea5   : > { %v1426_v11 = vadd.f32 %v1421_v7, %v2268_v32  ;;  %v1706_v12 = vpop.f32.mrb[27].mxu0 }
 0xea7   : > { %1427 = vst.msk [vmem:[%s469_s20] sm:$0xff] %vm476_vm0, %v1426_v11 }
 0xea8   : > { %1857 = shalt.err (!%p1854_p6)
}
 0xea9   : > { %s1858_s16 = scalar_lea.hbm %s2316_s29, 128  ;;  %s1862_s24 = scalar_lea.hbm %s2397_s19, 256 }
 0xeaa   : > { %p1859_p4 = scmp.ne.s32.totalorder %s2316_s29, %s1858_s16  ;;  %p1863_p1 = scmp.lt.u32.totalorder %s2316_s29, %s2397_s19 }
 0xeab   : > { %p1864_p2 = scmp.lt.u32.totalorder %s1862_s24, %s1858_s16  ;;  %p1866_p8 = scmp.lt.u32.totalorder %s1858_s16, %s2316_s29 }
 0xeac   : > { %p1860_p10 = pnand %p1859_p4, %p2398_p9 }
 0xead   : > { %p1865_p5 = por %p1864_p2, %p1863_p1 }
 0xeae   : > { %p1861_p12 = pneg %p1860_p10 }
 0xeaf   : > { %p1867_p11 = por %p1866_p8, %p1865_p5 }
 0xeb1   : > { %p1868_p0 = pnand %p1867_p11, %p1861_p12 }
 0xeb3   : > { %1871 = shalt.err (!%p1868_p0)
}
 0xeb4   : > { %1709 = dma.vmem_to_hbm [thread:$0]  (%p2398_p9), %s2318_s25, 128, %s2316_s29, %s1429_s28  }
 0xeb5 PF: > { %s2399_s18 = sld [smem:[#allocation9_spill]]  ;;  %p2400_p7 = scmp.ne.s32.totalorder %s2393_s23, 0 }
 0xeb6   : > { %p2401_p13 = scmp.ge.s32.totalorder %s1926_s30, 2 }
 0xeb8   : > { %p1716_p3 = pnand %p2401_p13, %p2400_p7 }
 0xebb   : > { %s1455_s22 = sand.u32 1, %s2399_s18  }
 0xebc   : > { %s1456_s13 = scalar_lea.sflag [#allocation5], %s1455_s22 }
 0xebd   : > { %1901 = dma.done.wait (!%p1716_p3), %s1456_s13, 128  }
 0xebe   : > { %1903 = vsyncadd (!%p1716_p3), %s1456_s13, 4294967168  ;;  %s29_s30 = sadd.s32 1, %s1926_s30   ;;  %s2402_s21 = sld [smem:[#allocation12_spill]] }
 0xebf   : > { %p26_p6 = scmp.ge.s32.totalorder %s29_s30, 4   ;;  %s2403_s28 = sld [smem:[#allocation10_spill]] }
 0xec0   : > { %s2404_s29 = sld [smem:[#allocation11_spill]]  ;;  %s2405_s25 = smov %s1910_s26 }
 0xec1   : > { %s2406_s26 = smov %s1914_s27  ;;  %28 = sbr.rel (!%p26_p6) target bundleno = 8 (0x8), region = 123 }
 0xec4   : > { %s2407_s27 = smov %s2402_s21 }
 0xec8   :  { %1461 = vsyncpa [#allocation4], 1 }
 0xec9   :  { %1463 = vsyncpa [#allocation4 + $0x1], 1 }
 0xeca   :  { %1464 = vsyncpa [#allocation5], 1 }
 0xecb   :  { %1466 = vsyncpa [#allocation5 + $0x1], 1 }

// kernel: siglip_encoder.2
= control target key start
LH: loop header
LB: loop body
LE: loop exit
PB: predicated region body
PF: predicated region fallthrough
CT: control target
= control target key end

     0   :  { %s1842_s25 = smov 0   ;;  %s1844_s26 = smov 0   ;;  %s2054_s0 = inlined_call_operand.vmem [shape: f32[2,8,32], index: 0, kind: input, shape index: {}, may-alias: {0,13}]   ;;  %s2055_s1 = inlined_call_operand.vmem [shape: f32[1,32], index: 1, kind: input, shape index: {}]   ;;  %s2056_s2 = inlined_call_operand.vmem [shape: f32[1,32], index: 2, kind: input, shape index: {}]   ;;  %s2057_s3 = inlined_call_operand.vmem [shape: bf16[32,96], index: 3, kind: input, shape index: {}]   ;;  %s2058_s4 = inlined_call_operand.vmem [shape: f32[1,96], index: 4, kind: input, shape index: {}]   ;;  %s2059_s5 = inlined_call_operand.vmem [shape: bf16[32,32], index: 5, kind: input, shape index: {}]   ;;  %s2060_s6 = inlined_call_operand.vmem [shape: f32[1,32], index: 6, kind: input, shape index: {}]   ;;  %s2061_s7 = inlined_call_operand.vmem [shape: f32[1,32], index: 7, kind: input, shape index: {}]   ;;  %s2062_s8 = inlined_call_operand.vmem [shape: f32[1,32], index: 8, kind: input, shape index: {}]   ;;  %s2063_s9 = inlined_call_operand.vmem [shape: bf16[32,64], index: 9, kind: input, shape index: {}]   ;;  %s2064_s10 = inlined_call_operand.vmem [shape: f32[1,64], index: 10, kind: input, shape index: {}]   ;;  %s2065_s11 = inlined_call_operand.vmem [shape: bf16[64,32], index: 11, kind: input, shape index: {}]   ;;  %s2066_s12 = inlined_call_operand.vmem [shape: f32[1,32], index: 12, kind: input, shape index: {}]   ;;  %s2067_s13 = inlined_call_operand.vmem [shape: f32[2,8,32], index: 13, kind: output, shape index: {}, may-alias: {0,13}]  }
   0x1   :  { %s1846_s27 = smov 0  }
   0x2 LB: > { %s35_s28 = sadd.s32 1, %s1753_s26  ;;  %p1493_p0 = scmp.ge.s32.totalorder %s1757_s27, 1  ;;  %s1757_s27 = sphi %s1846_s27, %s23_s27   ;;  %s1753_s26 = sphi %s1844_s26, %s2069_s26   ;;  %s1749_s25 = sphi %s1842_s25, %s2068_s25  }
   0x3   : > { %p37_p1 = scmp.ge.s32.totalorder %s35_s28, 2  ;;  %p400_p2 = scmp.lt.s32.totalorder %s1757_s27, 3 }
   0x5   : > { %s2071_s28 = smov (%p37_p1, %s35_s28), 0  ;;  %p401_p3 = pnand %p1493_p0, %p400_p2 }
   0x6   : > { %p445_p4 = scmp.lt.s32.totalorder (!%p401_p3), %s1749_s25, 1  ;;  %vm462_vm0 = vcmask (!%p401_p3), 261120   ;;  %v1703_v7 = vld [vmem:[%s2057_s3] sm:$0xff] (!%p401_p3)   ;;  %v1759_v8 = vmov (!%p401_p3), 0.0   ;;  %vm1760_vm1 = vmmov (!%p401_p3), 0   ;;  %v1704_v9 = vld [vmem:[%s2057_s3 + $0x8] sm:$0xff] (!%p401_p3)  }
   0x7   : > { %404 = sbr.rel (%p401_p3) target bundleno = 3708 (0xe7c), region = 72  ;;  %1566 = vmatprep.subr.bf16.mxu1 (!%p401_p3), %v1759_v8  ;;  %1570 = vmatprep.mubr.msk.bf16.mxu1 (!%p401_p3), %vm1760_vm1, %v1759_v8  ;;  %v1496_v14 = vld [vmem:[%s2055_s1] ss:$0 sm:$0xff] (!%p401_p3)  ;;  %vm561_vm2 = vcmask (!%p401_p3), 781312   ;;  %s1761_s14 = smov (!%p401_p3), 96   ;;  %vm577_vm3 = vcmask (!%p401_p3), 64512  }
   0x8   : > { %1567 = vmatpush3.bf16.msra.mxu1 (!%p401_p3), %v1703_v7  ;;  %1580 = vmatprep.subr.bf16.mxu0 (!%p401_p3), %v1759_v8  ;;  %v1497_v16 = vld [vmem:[%s2056_s2] ss:$0 sm:$0xff] (!%p401_p3)  ;;  %s1763_s16 = smov (!%p401_p3), 88   ;;  %s1764_s17 = smov (!%p401_p3), 56   ;;  %vm641_vm4 = vcmask (!%p401_p3), 1043456   ;;  %vm1368_vm5 = vcmask (!%p401_p3), 523264  }
   0x9   : > { %1568 = vmatprep.subr.bf16.mxu1 (!%p401_p3), %v1759_v8  ;;  %1582 = vmatprep.mubr.msk.bf16.mxu0 (!%p401_p3), %vm1760_vm1, %v1759_v8  ;;  %v1498_v20 = vld [vmem:[%s2058_s4] ss:$0 sm:$0xff] (!%p401_p3)  ;;  %s1765_s18 = smov (!%p401_p3), 64   ;;  %s1766_s19 = smov (!%p401_p3), 80  }
   0xa   : > { %s1767_s20 = smov (!%p401_p3), 112   ;;  %s1768_s30 = smov (!%p401_p3), 48  }
   0xc   : > { %1569 = vmatpush3.bf16.msra.mxu1 (!%p401_p3), %v1704_v9 }
   0xd   : > { %1574 = vmatprep.subr.bf16.mxu1 (!%p401_p3), %v1759_v8 }
   0xe   : > { %s2073_s25 = smov (!%p445_p4, %s1749_s25), 1 }
   0xf   : > { %s1494_s29 = sshll.u32 %s2073_s25, 3 }
  0x10   : > { %s448_s15 = scalar_lea.vmem %s2054_s0, %s1494_s29  ;;  %s455_s21 = scalar_lea.vmem %s2067_s13, %s1494_s29 }
  0x11   : > { %v1868_v0 = vld [vmem:[%s448_s15] sm:$0xff]  ;;  %s1762_s15 = smov 120  }
  0x12   : > { %v463_v1 = vsel %vm462_vm0, %v1868_v0, 0.0 }
  0x13   : > { %464 = vadd.xlane.f32.xlu0 %v463_v1 }
  0xa0   : > { %v465_v2 = vpop.xlane.xlu0 %464 }
  0xa1   : > { %v467_v3 = vmul.f32 0.03125, %v465_v2 }
  0xa3   : > { %v468_v4 = vsub.f32 %v1868_v0, %v467_v3 }
  0xa5   : > { %v469_v5 = vmul.f32 %v468_v4, %v468_v4 }
  0xa7   : > { %v470_v6 = vsel %vm462_vm0, %v469_v5, 0.0 }
  0xa8   : > { %471 = vadd.xlane.f32.xlu0 %v470_v6  ;;  %v801_v6 = vld [vmem:[%s2059_s5 + $0x4] sm:$0xf] }
  0xa9   : > { %v806_v7 = vsel %vm641_vm4, %v801_v6, 0 }
 0x135   : > { %v472_v10 = vpop.xlane.xlu0 %471 }
 0x136   : > { %v473_v11 = vmul.f32 0.03125, %v472_v10 }
 0x138   : > { %v474_v12 = vadd.f32 1e-06, %v473_v11 }
 0x13a   : > { %1713 = vrsqrt.f32 %v474_v12 }
 0x144   : > { %v1714_v13 = vpop.eup %1713 }
 0x145   : > { %v476_v15 = vmul.f32 %v1714_v13, %v468_v4  ;;  %v686_v4 = vld [vmem:[%s2059_s5] sm:$0xf] }
 0x146   : > { %v852_v5 = vsel %vm641_vm4, %v686_v4, 0 }
 0x147   : > { %v484_v17 = vmul.f32 %v1496_v14, %v476_v15 }
 0x149   : > { %v492_v18 = vadd.f32 %v1497_v16, %v484_v17 }
 0x14b   : > { %v493_v19 = vpack.c.bf16 %v492_v18, %v492_v18 }
 0x14d   : > { %1571 = vmatmul.mubr.msk.bf16.vlgmr.msra.gmra.mrb[0].mxu1 %vm462_vm0, %v493_v19 }
 0x14e   : > { %1576 = vmatprep.mubr.msk.bf16.mxu1 %vm1760_vm1, %v1759_v8 }
 0x220   : > { %v554_v21 = vpop.f32.mrb[0].mxu1 }
 0x221   : > { %v555_v22 = vadd.f32 %v1498_v20, %v554_v21  ;;  %v1572_v23 = vpop.f32.mrb[1].mxu1 }
 0x222   : > { %v557_v24 = vpop.f32.mrb[2].mxu1 }
 0x223   : > { %v560_v25 = vpack.c.bf16 %v555_v22, %v555_v22  ;;  %v1573_v26 = vpop.f32.mrb[3].mxu1 }
 0x225   : > { %562 = vst.msk [vmem:[#allocation2] sm:$0xf] %vm561_vm2, %v560_v25 }
 0x22c   : > { %v1900_v27 = vld [vmem:[#allocation2] ss:$0 sps:$4 sm:$0xff]  }
 0x22d   : > { %v570_v28 = vld [vmem:[#allocation2] sm:$0xf]  ;;  %575 = vrot.lane.b32.xlu1 %v1900_v27, %s1761_s14  ;;  %s1769_s14 = smov 104  }
 0x22e   : > { %v1902_v29 = vcombine.low %v570_v28, %v570_v28 }
 0x230   : > { %690 = vrot.lane.b32.xlu0 %v1902_v29, %s1762_s15  ;;  %s1770_s15 = smov 72  }
 0x231   : > { %692 = vrot.lane.b32.xlu1 %v1900_v27, %s1763_s16 }
 0x29f   : > { %v576_v30 = vpop.permute.xlu1 %575 }
 0x2a0   : > { %v582_v31 = vsel %vm577_vm3, %v576_v30, 0 }
 0x2a1   : > { %1575 = vmatpush3.bf16.xpose.msra.mxu1 %v582_v31 }
 0x2a2   : > { %1586 = vmatprep.subr.bf16.mxu1 %v1759_v8  ;;  %v691_v34 = vpop.permute.xlu0 %690 }
 0x2a3   : > { %v693_v32 = vpop.permute.xlu1 %692 }
 0x2a4   : > { %v698_v33 = vsel %vm577_vm3, %v693_v32, 0 }
 0x2a8   : > { %1577 = vmatmul.mubr.msk.bf16.vlgmr.msra.gmra.mrb[4].mxu1 %vm577_vm3, %v570_v28 }
 0x2a9   : > { %1587 = vmatpush3.bf16.xpose.msra.mxu1 %v698_v33  ;;  %1588 = vmatprep.mubr.msk.bf16.mxu1 %vm1760_vm1, %v1759_v8 }
 0x2aa   : > { %1598 = vmatprep.subr.bf16.mxu1 %v1759_v8 }
 0x2b0   : > { %1589 = vmatmul.mubr.msk.bf16.vlgmr.msra.gmra.mrb[8].mxu1 %vm577_vm3, %v691_v34 }
 0x2b1   : > { %1600 = vmatprep.mubr.msk.bf16.mxu1 %vm1760_vm1, %v1759_v8  ;;  %1599 = vmatpush3.bf16.msra.mxu1 %v806_v7 }
 0x2b2   : > { %1610 = vmatprep.subr.bf16.mxu1 %v1759_v8 }
 0x37b   : > { %v618_v35 = vpop.f32.mrb[4].mxu1 }
 0x37c   : > { %v1578_v36 = vpop.f32.mrb[5].mxu1  ;;  %v624_v37 = vsel %vm577_vm3, %v618_v35, -inf }
 0x37d   : > { %625 = vmax.xlane.f32.xlu1 %v624_v37  ;;  %v621_v38 = vpop.f32.mrb[6].mxu1 }
 0x37e   : > { %v1579_v39 = vpop.f32.mrb[7].mxu1 }
 0x383   : > { %v734_v40 = vpop.f32.mrb[8].mxu1 }
 0x384   : > { %v1590_v41 = vpop.f32.mrb[9].mxu1  ;;  %v740_v42 = vsel %vm577_vm3, %v734_v40, -inf }
 0x385   : > { %741 = vmax.xlane.f32.xlu0 %v740_v42  ;;  %v737_v43 = vpop.f32.mrb[10].mxu1 }
 0x386   : > { %v1591_v44 = vpop.f32.mrb[11].mxu1 }
 0x39b   : > { %752 = vrot.lane.b32.xlu0 %v1900_v27, %s1764_s17 }
 0x40a   : > { %v626_v45 = vpop.xlane.xlu1 %625 }
 0x40b   : > { %v627_v46 = vsub.f32 %v618_v35, %v626_v45 }
 0x40d   : > { %v628_v47 = vmul.f32 1.442695, %v627_v46 }
 0x40f   : > { %1715 = vpow2.f32 %v628_v47 }
 0x412   : > { %v742_v48 = vpop.xlane.xlu0 %741 }
 0x413   : > { %v743_v49 = vsub.f32 %v734_v40, %v742_v48 }
 0x415   : > { %v744_v50 = vmul.f32 1.442695, %v743_v49 }
 0x416   : > { %v753_v61 = vpop.permute.xlu0 %752 }
 0x417   : > { %1717 = vpow2.f32 %v744_v50  ;;  %v758_v63 = vsel %vm641_vm4, %v753_v61, 0 }
 0x419   : > { %v1716_v51 = vpop.eup %1715 }
 0x41a   : > { %v630_v52 = vsel %vm577_vm3, %v1716_v51, 0.0 }
 0x41b   : > { %631 = vadd.xlane.f32.xlu1 %v630_v52 }
 0x421   : > { %v1718_v53 = vpop.eup %1717 }
 0x422   : > { %v746_v54 = vsel %vm577_vm3, %v1718_v53, 0.0 }
 0x423   : > { %747 = vadd.xlane.f32.xlu1 %v746_v54 }
 0x434   : > { %636 = vrot.lane.b32.xlu1 %v1900_v27, %s1765_s18  ;;  %s1771_s18 = smov 40  }
 0x438   : > { %896 = vrot.lane.b32.xlu1 %v1900_v27, %s1766_s19 }
 0x43c   : > { %894 = vrot.lane.b32.xlu1 %v1902_v29, %s1767_s20 }
 0x4a8   : > { %v632_v55 = vpop.xlane.xlu1 %631 }
 0x4a9   : > { %1719 = vrcp.f32 %v632_v55 }
 0x4b0   : > { %v748_v56 = vpop.xlane.xlu1 %747 }
 0x4b1   : > { %1721 = vrcp.f32 %v748_v56 }
 0x4b3   : > { %v1720_v57 = vpop.eup %1719 }
 0x4b4   : > { %v637_v58 = vpop.permute.xlu1 %636  ;;  %v634_v59 = vmul.f32 %v1720_v57, %v1716_v51  ;;  %v1005_v51 = vld [vmem:[%s2059_s5 + $0x8] sm:$0xf] }
 0x4b5   : > { %v643_v60 = vsel %vm641_vm4, %v637_v58, 0  ;;  %v1010_v52 = vsel %vm641_vm4, %v1005_v51, 0  ;;  %v1711_v51 = vld [vmem:[%s2065_s11 + $0x10] sm:$0xff]  }
 0x4b6   : > { %1581 = vmatpush3.bf16.msra.mxu0 %v643_v60  ;;  %v635_v62 = vpack.c.bf16 %v634_v59, %v634_v59 }
 0x4b7   : > { %1592 = vmatprep.subr.bf16.mxu0 %v1759_v8 }
 0x4b8   : > { %v897_v14 = vpop.permute.xlu1 %896 }
 0x4b9   : > { %1583 = vmatmul.mubr.msk.bf16.vlgmr.msra.gmra.mrb[0].mxu0 %vm577_vm3, %v635_v62  ;;  %v902_v19 = vsel %vm577_vm3, %v897_v14, 0 }
 0x4ba   : > { %1593 = vmatpush3.bf16.msra.mxu0 %v758_v63  ;;  %1594 = vmatprep.mubr.msk.bf16.mxu0 %vm1760_vm1, %v1759_v8 }
 0x4bb   : > { %v1722_v1 = vpop.eup %1721  ;;  %1604 = vmatprep.subr.bf16.mxu0 %v1759_v8 }
 0x4bc   : > { %v750_v2 = vmul.f32 %v1722_v1, %v1718_v53  ;;  %v895_v21 = vpop.permute.xlu1 %894 }
 0x4be   : > { %v751_v3 = vpack.c.bf16 %v750_v2, %v750_v2 }
 0x4c1   : > { %1595 = vmatmul.mubr.msk.bf16.vlgmr.msra.gmra.mrb[4].mxu0 %vm577_vm3, %v751_v3 }
 0x4c2   : > { %1606 = vmatprep.mubr.msk.bf16.mxu0 %vm1760_vm1, %v1759_v8  ;;  %1605 = vmatpush3.bf16.msra.mxu0 %v852_v5  ;;  %v1164_v5 = vld [vmem:[%s2059_s5 + $0xc] sm:$0xf] }
 0x4c3   : > { %1616 = vmatprep.subr.bf16.mxu0 %v1759_v8  ;;  %v1169_v6 = vsel %vm641_vm4, %v1164_v5, 0  ;;  %v1523_v5 = vld [vmem:[%s2066_s12] ss:$0 sm:$0xff] }
 0x58c   : > { %v679_v9 = vpop.f32.mrb[0].mxu0 }
 0x58d   : > { %v685_v10 = vpack.c.bf16 %v679_v9, %v679_v9  ;;  %v1584_v11 = vpop.f32.mrb[1].mxu0 }
 0x58e   : > { %v682_v12 = vpop.f32.mrb[2].mxu0 }
 0x58f   : > { %v1585_v13 = vpop.f32.mrb[3].mxu0  ;;  %1607 = vmatmul.mubr.msk.bf16.vlgmr.msra.gmra.mrb[8].mxu0 %vm577_vm3, %v685_v10 }
 0x590   : > { %1618 = vmatprep.mubr.msk.bf16.mxu0 %vm1760_vm1, %v1759_v8 }
 0x594   : > { %v794_v15 = vpop.f32.mrb[4].mxu0 }
 0x595   : > { %v800_v16 = vpack.c.bf16 %v794_v15, %v794_v15  ;;  %v1596_v17 = vpop.f32.mrb[5].mxu0 }
 0x596   : > { %v797_v18 = vpop.f32.mrb[6].mxu0 }
 0x597   : > { %v1597_v20 = vpop.f32.mrb[7].mxu0  ;;  %1601 = vmatmul.mubr.msk.bf16.vlgmr.msra.gmra.mrb[12].mxu1 %vm577_vm3, %v800_v16 }
 0x598   : > { %1611 = vmatpush3.bf16.xpose.msra.mxu1 %v902_v19  ;;  %1612 = vmatprep.mubr.msk.bf16.mxu1 %vm1760_vm1, %v1759_v8 }
 0x599   : > { %1622 = vmatprep.subr.bf16.mxu1 %v1759_v8 }
 0x59f   : > { %1613 = vmatmul.mubr.msk.bf16.vlgmr.msra.gmra.mrb[16].mxu1 %vm577_vm3, %v895_v21 }
 0x5a0   : > { %1624 = vmatprep.mubr.msk.bf16.mxu1 %vm1760_vm1, %v1759_v8  ;;  %1623 = vmatpush3.bf16.msra.mxu1 %v1010_v52  ;;  %v1712_v52 = vld [vmem:[%s2065_s11 + $0x18] sm:$0xff]  }
 0x5a1   : > { %1634 = vmatprep.subr.bf16.mxu1 %v1759_v8 }
 0x662   : > { %v888_v22 = vpop.f32.mrb[8].mxu0 }
 0x663   : > { %v1608_v23 = vpop.f32.mrb[9].mxu0 }
 0x664   : > { %v891_v24 = vpop.f32.mrb[10].mxu0 }
 0x665   : > { %v1609_v25 = vpop.f32.mrb[11].mxu0 }
 0x66a   : > { %v842_v26 = vpop.f32.mrb[12].mxu1 }
 0x66b   : > { %v1956_v28 = vadd.f32 %v888_v22, %v842_v26  ;;  %v1602_v30 = vpop.f32.mrb[13].mxu1  ;;  %v1516_v26 = vld [vmem:[%s2060_s6] ss:$0 sm:$0xff] }
 0x66c   : > { %v845_v31 = vpop.f32.mrb[14].mxu1 }
 0x66d   : > { %v1603_v32 = vpop.f32.mrb[15].mxu1 }
 0x672   : > { %v938_v33 = vpop.f32.mrb[16].mxu1 }
 0x673   : > { %v1614_v34 = vpop.f32.mrb[17].mxu1  ;;  %v944_v35 = vsel %vm577_vm3, %v938_v33, -inf }
 0x674   : > { %945 = vmax.xlane.f32.xlu1 %v944_v35  ;;  %v941_v36 = vpop.f32.mrb[18].mxu1 }
 0x675   : > { %v1615_v37 = vpop.f32.mrb[19].mxu1 }
 0x685   : > { %956 = vrot.lane.b32.xlu1 %v1900_v27, %s1768_s30 }
 0x689   : > { %1053 = vrot.lane.b32.xlu1 %v1902_v29, %s1769_s14 }
 0x701   : > { %v946_v38 = vpop.xlane.xlu1 %945 }
 0x702   : > { %v947_v39 = vsub.f32 %v938_v33, %v946_v38 }
 0x704   : > { %v948_v40 = vmul.f32 1.442695, %v947_v39  ;;  %v1707_v39 = vld [vmem:[%s2063_s9] sm:$0xff]  }
 0x705   : > { %v957_v41 = vpop.permute.xlu1 %956 }
 0x706   : > { %1723 = vpow2.f32 %v948_v40  ;;  %v962_v42 = vsel %vm641_vm4, %v957_v41, 0 }
 0x707   : > { %1617 = vmatpush3.bf16.msra.mxu0 %v962_v42 }
 0x708   : > { %1628 = vmatprep.subr.bf16.mxu0 %v1759_v8 }
 0x709   : > { %v1054_v50 = vpop.permute.xlu1 %1053 }
 0x710   : > { %v1724_v43 = vpop.eup %1723 }
 0x711   : > { %v950_v44 = vsel %vm577_vm3, %v1724_v43, 0.0 }
 0x712   : > { %951 = vadd.xlane.f32.xlu0 %v950_v44  ;;  %v1517_v44 = vld [vmem:[%s2061_s7] ss:$0 sm:$0xff] }
 0x728   : > { %1055 = vrot.lane.b32.xlu0 %v1900_v27, %s1770_s15 }
 0x79f   : > { %v952_v45 = vpop.xlane.xlu0 %951 }
 0x7a0   : > { %1725 = vrcp.f32 %v952_v45 }
 0x7a3   : > { %v1056_v47 = vpop.permute.xlu0 %1055 }
 0x7a4   : > { %v1061_v49 = vsel %vm577_vm3, %v1056_v47, 0 }
 0x7aa   : > { %v1726_v29 = vpop.eup %1725 }
 0x7ab   : > { %v954_v46 = vmul.f32 %v1726_v29, %v1724_v43  ;;  %v1518_v29 = vld [vmem:[%s2062_s8] ss:$0 sm:$0xff] }
 0x7ad   : > { %v955_v48 = vpack.c.bf16 %v954_v46, %v954_v46 }
 0x7af   : > { %1619 = vmatmul.mubr.msk.bf16.vlgmr.msra.gmra.mrb[12].mxu0 %vm577_vm3, %v955_v48 }
 0x7b0   : > { %1629 = vmatpush3.bf16.xpose.msra.mxu0 %v1061_v49  ;;  %1630 = vmatprep.mubr.msk.bf16.mxu0 %vm1760_vm1, %v1759_v8  ;;  %v1709_v49 = vld [vmem:[%s2065_s11] sm:$0xff]  }
 0x7b1   : > { %1640 = vmatprep.subr.bf16.mxu0 %v1759_v8 }
 0x7b7   : > { %1631 = vmatmul.mubr.msk.bf16.vlgmr.msra.gmra.mrb[16].mxu0 %vm577_vm3, %v1054_v50  ;;  %v1710_v50 = vld [vmem:[%s2065_s11 + $0x8] sm:$0xff]  }
 0x7b8   : > { %1642 = vmatprep.mubr.msk.bf16.mxu0 %vm1760_vm1, %v1759_v8  ;;  %1641 = vmatpush3.bf16.msra.mxu0 %v1169_v6 }
 0x7b9   : > { %1654 = vmatprep.subr.bf16.mxu0 %v1759_v8 }
 0x882   : > { %v998_v53 = vpop.f32.mrb[12].mxu0 }
 0x883   : > { %v1004_v54 = vpack.c.bf16 %v998_v53, %v998_v53  ;;  %v1620_v55 = vpop.f32.mrb[13].mxu0  ;;  %v1519_v53 = vld [vmem:[%s2064_s10] ss:$0 sm:$0xff] }
 0x884   : > { %v1001_v56 = vpop.f32.mrb[14].mxu0 }
 0x885   : > { %v1621_v57 = vpop.f32.mrb[15].mxu0  ;;  %1625 = vmatmul.mubr.msk.bf16.vlgmr.msra.gmra.mrb[20].mxu1 %vm577_vm3, %v1004_v54 }
 0x886   : > { %1636 = vmatprep.mubr.msk.bf16.mxu1 %vm1760_vm1, %v1759_v8 }
 0x88a   : > { %v1097_v58 = vpop.f32.mrb[16].mxu0 }
 0x88b   : > { %v1632_v59 = vpop.f32.mrb[17].mxu0  ;;  %v1103_v60 = vsel %vm577_vm3, %v1097_v58, -inf }
 0x88c   : > { %1104 = vmax.xlane.f32.xlu1 %v1103_v60  ;;  %v1100_v61 = vpop.f32.mrb[18].mxu0 }
 0x88d   : > { %v1633_v62 = vpop.f32.mrb[19].mxu0 }
 0x919   : > { %v1105_v63 = vpop.xlane.xlu1 %1104 }
 0x91a   : > { %v1106_v1 = vsub.f32 %v1097_v58, %v1105_v63 }
 0x91c   : > { %v1107_v2 = vmul.f32 1.442695, %v1106_v1 }
 0x91e   : > { %1727 = vpow2.f32 %v1107_v2 }
 0x928   : > { %v1728_v3 = vpop.eup %1727 }
 0x929   : > { %v1109_v4 = vsel %vm577_vm3, %v1728_v3, 0.0 }
 0x92a   : > { %1110 = vadd.xlane.f32.xlu0 %v1109_v4 }
 0x940   : > { %1115 = vrot.lane.b32.xlu0 %v1900_v27, %s1771_s18 }
 0x958   : > { %v1046_v7 = vpop.f32.mrb[20].mxu1 }
 0x959   : > { %v1052_v9 = vadd.f32 %v1046_v7, %v1956_v28  ;;  %v1626_v10 = vpop.f32.mrb[21].mxu1 }
 0x95a   : > { %v1049_v11 = vpop.f32.mrb[22].mxu1 }
 0x95b   : > { %v1627_v12 = vpop.f32.mrb[23].mxu1 }
 0x9b7   : > { %v1111_v13 = vpop.xlane.xlu0 %1110 }
 0x9b8   : > { %1729 = vrcp.f32 %v1111_v13 }
 0x9bb   : > { %v1116_v14 = vpop.permute.xlu0 %1115 }
 0x9bc   : > { %v1121_v27 = vsel %vm641_vm4, %v1116_v14, 0 }
 0x9bd   : > { %1635 = vmatpush3.bf16.msra.mxu1 %v1121_v27 }
 0x9be   : > { %1646 = vmatprep.subr.bf16.mxu1 %v1759_v8 }
 0x9c2   : > { %v1730_v15 = vpop.eup %1729 }
 0x9c3   : > { %v1113_v16 = vmul.f32 %v1730_v15, %v1728_v3 }
 0x9c5   : > { %v1114_v17 = vpack.c.bf16 %v1113_v16, %v1113_v16 }
 0x9c7   : > { %1637 = vmatmul.mubr.msk.bf16.vlgmr.msra.gmra.mrb[24].mxu1 %vm577_vm3, %v1114_v17 }
 0x9c8   : > { %1650 = vmatprep.mubr.msk.bf16.mxu1 %vm1760_vm1, %v1759_v8  ;;  %1647 = vmatpush3.bf16.msra.mxu1 %v1707_v39 }
 0x9c9   : > { %1648 = vmatprep.subr.bf16.mxu1 %v1759_v8 }
 0xa9a   : > { %v1157_v18 = vpop.f32.mrb[24].mxu1 }
 0xa9b   : > { %v1163_v19 = vpack.c.bf16 %v1157_v18, %v1157_v18  ;;  %v1638_v20 = vpop.f32.mrb[25].mxu1 }
 0xa9c   : > { %v1160_v21 = vpop.f32.mrb[26].mxu1 }
 0xa9d   : > { %v1639_v22 = vpop.f32.mrb[27].mxu1  ;;  %1643 = vmatmul.mubr.msk.bf16.vlgmr.msra.gmra.mrb[20].mxu0 %vm577_vm3, %v1163_v19 }
 0xa9e   : > { %1662 = vmatprep.mubr.msk.bf16.mxu0 %vm1760_vm1, %v1759_v8  ;;  %1655 = vmatpush3.bf16.msra.mxu0 %v1709_v49 }
 0xa9f   : > { %1656 = vmatprep.subr.bf16.mxu0 %v1759_v8 }
 0xaa2   : > { %1657 = vmatpush3.bf16.msra.mxu0 %v1710_v50 }
 0xaa3   : > { %1658 = vmatprep.subr.bf16.mxu0 %v1759_v8 }
 0xaa6   : > { %1659 = vmatpush3.bf16.msra.mxu0 %v1711_v51 }
 0xaa7   : > { %1660 = vmatprep.subr.bf16.mxu0 %v1759_v8 }
 0xaaa   : > { %1661 = vmatpush3.bf16.msra.mxu0 %v1712_v52 }
 0xb70   : > { %v1205_v23 = vpop.f32.mrb[20].mxu0 }
 0xb71   : > { %v1211_v24 = vadd.f32 %v1205_v23, %v1052_v9  ;;  %v1644_v25 = vpop.f32.mrb[21].mxu0 }
 0xb72   : > { %v1208_v28 = vpop.f32.mrb[22].mxu0 }
 0xb73   : > { %v1212_v30 = vadd.f32 %v1211_v24, %v1868_v0  ;;  %v1645_v31 = vpop.f32.mrb[23].mxu0  ;;  %v1708_v0 = vld [vmem:[%s2063_s9 + $0x8] sm:$0xff]  }
 0xb74   : > { %1649 = vmatpush3.bf16.msra.mxu1 %v1708_v0 }
 0xb75   : > { %v1220_v32 = vadd.f32 %v1516_v26, %v1212_v30 }
 0xb77   : > { %v1222_v33 = vsel %vm462_vm0, %v1220_v32, 0.0 }
 0xb78   : > { %1223 = vadd.xlane.f32.xlu1 %v1222_v33 }
 0xc05   : > { %v1224_v34 = vpop.xlane.xlu1 %1223 }
 0xc06   : > { %v1226_v35 = vmul.f32 0.03125, %v1224_v34 }
 0xc08   : > { %v1227_v36 = vsub.f32 %v1220_v32, %v1226_v35 }
 0xc0a   : > { %v1228_v37 = vmul.f32 %v1227_v36, %v1227_v36 }
 0xc0c   : > { %v1229_v38 = vsel %vm462_vm0, %v1228_v37, 0.0 }
 0xc0d   : > { %1230 = vadd.xlane.f32.xlu1 %v1229_v38 }
 0xc9a   : > { %v1231_v40 = vpop.xlane.xlu1 %1230 }
 0xc9b   : > { %v1232_v41 = vmul.f32 0.03125, %v1231_v40 }
 0xc9d   : > { %v1233_v42 = vadd.f32 1e-06, %v1232_v41 }
 0xc9f   : > { %1731 = vrsqrt.f32 %v1233_v42 }
 0xca9   : > { %v1732_v43 = vpop.eup %1731 }
 0xcaa   : > { %v1235_v45 = vmul.f32 %v1732_v43, %v1227_v36 }
 0xcac   : > { %v1243_v46 = vmul.f32 %v1517_v44, %v1235_v45 }
 0xcae   : > { %v1251_v47 = vadd.f32 %v1518_v29, %v1243_v46 }
 0xcb0   : > { %v1252_v48 = vpack.c.bf16 %v1251_v47, %v1251_v47 }
 0xcb2   : > { %1651 = vmatmul.mubr.msk.bf16.vlgmr.msra.gmra.mrb[28].mxu1 %vm462_vm0, %v1252_v48 }
 0xd85   : > { %v1313_v54 = vpop.f32.mrb[28].mxu1 }
 0xd86   : > { %v1314_v55 = vadd.f32 %v1519_v53, %v1313_v54  ;;  %v1652_v56 = vpop.f32.mrb[29].mxu1 }
 0xd87   : > { %v1316_v57 = vpop.f32.mrb[30].mxu1 }
 0xd88   : > { %v1320_v58 = vmul.f32 0.044715, %v1314_v55  ;;  %v1653_v59 = vpop.f32.mrb[31].mxu1  ;;  %v1319_v2 = vmul.f32 0.5, %v1314_v55 }
 0xd8a   : > { %v1321_v60 = vmul.f32 %v1320_v58, %v1314_v55 }
 0xd8c   : > { %v1322_v61 = vmul.f32 %v1321_v60, %v1314_v55 }
 0xd8e   : > { %v1323_v62 = vadd.f32 %v1322_v61, %v1314_v55 }
 0xd90   : > { %v1324_v63 = vmul.f32 0.7978846, %v1323_v62 }
 0xd92   : > { %1733 = vtanh.f32 %v1324_v63 }
 0xd9c   : > { %v1734_v1 = vpop.eup %1733 }
 0xd9d   : > { %v1326_v8 = vadd.f32 1.0, %v1734_v1 }
 0xd9f   : > { %v1327_v3 = vmul.f32 %v1326_v8, %v1319_v2 }
 0xda1   : > { %v1328_v4 = vpack.c.bf16 %v1327_v3, %v1327_v3 }
 0xda3   : > { %1663 = vmatmul.mubr.msk.bf16.vlgmr.msra.gmra.mrb[24].mxu0 %vm1368_vm5, %v1328_v4 }
 0xe76   : > { %v1406_v6 = vpop.f32.mrb[24].mxu0 }
 0xe77   : > { %v1407_v7 = vadd.f32 %v1523_v5, %v1406_v6  ;;  %v1664_v9 = vpop.f32.mrb[25].mxu0 }
 0xe78   : > { %v1409_v10 = vpop.f32.mrb[26].mxu0 }
 0xe79   : > { %v1412_v11 = vadd.f32 %v1407_v7, %v1220_v32  ;;  %v1665_v12 = vpop.f32.mrb[27].mxu0 }
 0xe7b   : > { %1413 = vst.msk [vmem:[%s455_s21] sm:$0xff] %vm462_vm0, %v1412_v11 }
 0xe7c PF: > { %s23_s27 = sadd.s32 1, %s1757_s27   ;;  %s2068_s25 = smov %s1753_s26 }
 0xe7d   : > { %p20_p5 = scmp.ge.s32.totalorder %s23_s27, 4   ;;  %s2069_s26 = smov %s2071_s28 }
 0xe7f   :  { %22 = sbr.rel (!%p20_p5) target bundleno = 2 (0x2), region = 108 }

</bundles_post_ra>
